<compile_context>
chip_gen: v7x
topology: tpu7x:2x2x1
jax: 0.10.0
libtpu: 0.0.40
codegen_flags: <defaults>
</compile_context>

<pallas_src>
import math
from functools import partial

import jax
import jax.numpy as jnp
from jax.experimental import pallas as pl
from jax.experimental.pallas import tpu as pltpu

# ---------------- small synthetic RoBERTa config ----------------
VOCAB = 100
HIDDEN = 32
LAYERS = 2
HEADS = 2
HEAD_DIM = HIDDEN // HEADS
INTERMEDIATE = 64
MAX_POS = 40
TYPE_VOCAB = 1
PAD_ID = 1          # RoBERTa padding_idx
EPS = 1e-5
NUM_LABELS = 2      # qa_outputs -> (start, end)


# ---------------- in-kernel helpers (trace-time) ----------------
def _ln(x, g, b):
    """LayerNorm over the last axis, f32 math."""
    mean = jnp.mean(x, axis=-1, keepdims=True)
    c = x - mean
    var = jnp.mean(c * c, axis=-1, keepdims=True)
    return c * jax.lax.rsqrt(var + EPS) * g + b


# ---------------- Pallas kernels ----------------
def _emb_ln_kernel(x_ref, g_ref, b_ref, o_ref):
    # embedding LayerNorm (no residual, no zero-tensor DMA)
    o_ref[...] = _ln(x_ref[...], g_ref[...], b_ref[...]).astype(o_ref.dtype)


def embedding_layernorm(x, gamma, beta):
    M, H = x.shape
    return pl.pallas_call(
        _emb_ln_kernel,
        out_shape=jax.ShapeDtypeStruct((M, H), jnp.float32),
    )(x, gamma, beta)


def _encoder_layer_kernel(x_ref, mask_ref, wqkv_ref, bqkv_ref, wo_ref, bo_ref,
                          ln1g_ref, ln1b_ref, wi_ref, bi_ref, wf_ref, bf_ref,
                          ln2g_ref, ln2b_ref, *rest,
                          batch, seq, heads, head_dim, scale, do_qa):
    """Whole encoder layer fused into one VMEM-resident kernel.

    x:    (batch*seq, hidden)      mask: (batch, seq) additive f32
    wqkv: (hidden, 3*hidden)       wo:   (hidden, hidden)
    wi:   (hidden, intermediate)   wf:   (intermediate, hidden)
    If do_qa: also qa_w (hidden, NUM_LABELS), qa_b (1, NUM_LABELS) inputs and
    a logits output.
    """
    if do_qa:
        qa_w_ref, qa_b_ref, o_ref, logits_ref, ctx_scr = rest
    else:
        o_ref, ctx_scr = rest

    hidden = heads * head_dim
    x = x_ref[...]                                      # (M, hidden) f32

    # ---- fused QKV projection: one MXU pass with N = 3*hidden ----
    qkv = jnp.dot(x.astype(jnp.bfloat16),
                  wqkv_ref[...].astype(jnp.bfloat16),
                  preferred_element_type=jnp.float32) + bqkv_ref[...]
    q = qkv[:, 0 * hidden:1 * hidden]
    k = qkv[:, 1 * hidden:2 * hidden]
    v = qkv[:, 2 * hidden:3 * hidden]

    mask = mask_ref[...]                                # (batch, seq) f32 additive

    # ---- multi-head attention, statically unrolled over (batch, head) ----
    # heads stay as static lane-slices of the [M, hidden] activations; no
    # [B,H,S,D] tensors, no HBM transposes.  f32 softmax for stability.
    for b in range(batch):
        r0 = b * seq
        mb = mask[b:b + 1, :]                           # (1, seq)
        for h in range(heads):
            c0 = h * head_dim
            qh = q[r0:r0 + seq, c0:c0 + head_dim]       # (seq, head_dim)
            kh = k[r0:r0 + seq, c0:c0 + head_dim]
            vh = v[r0:r0 + seq, c0:c0 + head_dim]
            s = jax.lax.dot_general(                    # q @ k^T
                qh, kh, (((1,), (1,)), ((), ())),
                preferred_element_type=jnp.float32) * scale
            s = s + mb                                  # broadcast over query rows
            s = s - jnp.max(s, axis=-1, keepdims=True)  # stable softmax
            p = jnp.exp(s)
            p = p * pl.reciprocal(jnp.sum(p, axis=-1, keepdims=True), approx=True)
            ctx_scr[r0:r0 + seq, c0:c0 + head_dim] = jnp.dot(
                p, vh, preferred_element_type=jnp.float32)

    ctx = ctx_scr[...]                                  # (M, hidden) f32

    # ---- attention output projection + residual + LayerNorm ----
    attn_out = jnp.dot(ctx.astype(jnp.bfloat16),
                       wo_ref[...].astype(jnp.bfloat16),
                       preferred_element_type=jnp.float32) + bo_ref[...]
    h1 = _ln(attn_out + x, ln1g_ref[...], ln1b_ref[...])

    # ---- FFN + residual + LayerNorm ----
    inter = jnp.dot(h1.astype(jnp.bfloat16),
                    wi_ref[...].astype(jnp.bfloat16),
                    preferred_element_type=jnp.float32) + bi_ref[...]
    # TODO(synk): HF/PyTorch RoBERTa uses exact (erf) GELU; tanh approximation used here.
    inter = jax.nn.gelu(inter, approximate=True)
    ffn = jnp.dot(inter.astype(jnp.bfloat16),
                  wf_ref[...].astype(jnp.bfloat16),
                  preferred_element_type=jnp.float32) + bf_ref[...]
    out = _ln(ffn + h1, ln2g_ref[...], ln2b_ref[...])

    o_ref[...] = out.astype(o_ref.dtype)

    # ---- QA head folded into the last layer's kernel ----
    if do_qa:
        logits = jnp.dot(out.astype(jnp.bfloat16),
                         qa_w_ref[...].astype(jnp.bfloat16),
                         preferred_element_type=jnp.float32) + qa_b_ref[...]
        logits_ref[...] = logits.astype(logits_ref.dtype)


def encoder_layer(x, ext_mask, lp, batch, seq, qa=None):
    """One fused encoder layer (optionally also producing QA logits)."""
    M, H = x.shape
    do_qa = qa is not None

    inputs = [x, ext_mask,
              lp["wqkv"], lp["bqkv"], lp["wo"], lp["bo"],
              lp["ln1_g"], lp["ln1_b"],
              lp["wi"], lp["bi"], lp["wf"], lp["bf"],
              lp["ln2_g"], lp["ln2_b"]]
    if do_qa:
        inputs += [qa[0], qa[1]]
        out_shape = (jax.ShapeDtypeStruct((M, H), jnp.float32),
                     jax.ShapeDtypeStruct((M, NUM_LABELS), jnp.float32))
    else:
        out_shape = jax.ShapeDtypeStruct((M, H), jnp.float32)

    kern = partial(_encoder_layer_kernel,
                   batch=batch, seq=seq, heads=HEADS, head_dim=HEAD_DIM,
                   scale=1.0 / math.sqrt(HEAD_DIM), do_qa=do_qa)

    res = pl.pallas_call(
        kern,
        out_shape=out_shape,
        scratch_shapes=[pltpu.VMEM((M, H), jnp.float32)],   # attention context
    )(*inputs)

    if do_qa:
        return res[0], res[1]
    return res


# ---------------- plain-JAX glue ----------------
def create_position_ids(input_ids, padding_idx=PAD_ID):
    mask = (input_ids != padding_idx).astype(jnp.int32)
    incremental = jnp.cumsum(mask, axis=1) * mask
    return incremental + padding_idx


def init_params(key):
    ks = iter(jax.random.split(key, 64))

    def w(shape):
        return 0.02 * jax.random.normal(next(ks), shape, dtype=jnp.float32)

    params = {
        "word_emb": w((VOCAB, HIDDEN)),
        "pos_emb": w((MAX_POS, HIDDEN)),
        "type_emb": w((TYPE_VOCAB, HIDDEN)),
        "emb_ln_g": jnp.ones((1, HIDDEN), jnp.float32),
        "emb_ln_b": jnp.zeros((1, HIDDEN), jnp.float32),
        "layers": [],
    }
    for _ in range(LAYERS):
        wq, wk, wv = w((HIDDEN, HIDDEN)), w((HIDDEN, HIDDEN)), w((HIDDEN, HIDDEN))
        params["layers"].append({
            # fused QKV weight/bias (equivalent to separate wq/wk/wv matmuls)
            "wqkv": jnp.concatenate([wq, wk, wv], axis=1),
            "bqkv": jnp.zeros((1, 3 * HIDDEN), jnp.float32),
            "wo": w((HIDDEN, HIDDEN)), "bo": jnp.zeros((1, HIDDEN), jnp.float32),
            "ln1_g": jnp.ones((1, HIDDEN), jnp.float32),
            "ln1_b": jnp.zeros((1, HIDDEN), jnp.float32),
            "wi": w((HIDDEN, INTERMEDIATE)), "bi": jnp.zeros((1, INTERMEDIATE), jnp.float32),
            "wf": w((INTERMEDIATE, HIDDEN)), "bf": jnp.zeros((1, HIDDEN), jnp.float32),
            "ln2_g": jnp.ones((1, HIDDEN), jnp.float32),
            "ln2_b": jnp.zeros((1, HIDDEN), jnp.float32),
        })
    params["qa_w"] = w((HIDDEN, NUM_LABELS))
    params["qa_b"] = jnp.zeros((1, NUM_LABELS), jnp.float32)
    return params


@jax.jit
def roberta_qa_forward(params, input_ids, attention_mask):
    B, S = input_ids.shape

    # ----- embeddings (gathers are glue; LayerNorm is a Pallas kernel) -----
    position_ids = create_position_ids(input_ids)
    token_type_ids = jnp.zeros_like(input_ids)
    emb = (jnp.take(params["word_emb"], input_ids, axis=0)
           + jnp.take(params["pos_emb"], position_ids, axis=0)
           + jnp.take(params["type_emb"], token_type_ids, axis=0))
    x = emb.reshape(B * S, HIDDEN).astype(jnp.float32)
    x = embedding_layernorm(x, params["emb_ln_g"], params["emb_ln_b"])

    # additive attention mask (B, S), kept in f32 (softmax math stays f32)
    ext_mask = (1.0 - attention_mask.astype(jnp.float32)) * (-1e9)

    # ----- encoder layers: one fused pallas_call each; QA head fused in last -----
    n_layers = len(params["layers"])
    logits = None
    for li, lp in enumerate(params["layers"]):
        if li == n_layers - 1:
            x, logits = encoder_layer(x, ext_mask, lp, B, S,
                                      qa=(params["qa_w"], params["qa_b"]))
        else:
            x = encoder_layer(x, ext_mask, lp, B, S)

    logits = logits.reshape(B, S, NUM_LABELS)
    start_logits = logits[..., 0]
    end_logits = logits[..., 1]
    # TODO(synk): optional CrossEntropyLoss path (start_positions/end_positions) not implemented.
    return start_logits, end_logits


if __name__ == "__main__":
    root = jax.random.PRNGKey(0)
    k_params, k_ids = jax.random.split(root)

    params = init_params(k_params)

    B, S = 2, 8
    input_ids = jax.random.randint(k_ids, (B, S), 2, VOCAB, dtype=jnp.int32)
    attention_mask = jnp.ones((B, S), dtype=jnp.int32)

    start_logits, end_logits = roberta_qa_forward(params, input_ids, attention_mask)
    jax.block_until_ready((start_logits, end_logits))

    assert start_logits.shape == (B, S) and end_logits.shape == (B, S)
    assert bool(jnp.all(jnp.isfinite(start_logits))) and bool(jnp.all(jnp.isfinite(end_logits)))
    print("KERNEL_OK")
</pallas_src>

<mosaic_0001>
module attributes {stable_mosaic.version = 11 : i64} {
  func.func @_emb_ln_kernel(%arg0: memref<16x32xf32, #tpu.memory_space<vmem>>, %arg1: memref<1x32xf32, #tpu.memory_space<vmem>>, %arg2: memref<1x32xf32, #tpu.memory_space<vmem>>, %arg3: memref<16x32xf32, #tpu.memory_space<vmem>>) attributes {dimension_semantics = [], scalar_prefetch = 0 : i64, scratch_operands = 0 : i64, tpu.core_type = #tpu.core_type<tc>} {
    %c0 = arith.constant 0 : index
    %c0_0 = arith.constant 0 : index
    %0 = vector.load %arg0[%c0, %c0_0] : memref<16x32xf32, #tpu.memory_space<vmem>>, vector<16x32xf32>
    %c0_1 = arith.constant 0 : index
    %c0_2 = arith.constant 0 : index
    %1 = vector.load %arg1[%c0_1, %c0_2] : memref<1x32xf32, #tpu.memory_space<vmem>>, vector<1x32xf32>
    %c0_3 = arith.constant 0 : index
    %c0_4 = arith.constant 0 : index
    %2 = vector.load %arg2[%c0_3, %c0_4] : memref<1x32xf32, #tpu.memory_space<vmem>>, vector<1x32xf32>
    %cst = arith.constant dense<0.000000e+00> : vector<16xf32>
    %3 = vector.multi_reduction <add>, %0, %cst [1] : vector<16x32xf32> to vector<16xf32>
    %4 = vector.shape_cast %3 : vector<16xf32> to vector<16x1xf32>
    %cst_5 = arith.constant 3.200000e+01 : f32
    %5 = vector.broadcast %cst_5 : f32 to vector<16x1xf32>
    %6 = arith.divf %4, %5 : vector<16x1xf32>
    %7 = vector.broadcast %6 : vector<16x1xf32> to vector<16x32xf32>
    %8 = arith.subf %0, %7 : vector<16x32xf32>
    %9 = arith.mulf %8, %8 : vector<16x32xf32>
    %cst_6 = arith.constant dense<0.000000e+00> : vector<16xf32>
    %10 = vector.multi_reduction <add>, %9, %cst_6 [1] : vector<16x32xf32> to vector<16xf32>
    %11 = vector.shape_cast %10 : vector<16xf32> to vector<16x1xf32>
    %cst_7 = arith.constant 3.200000e+01 : f32
    %12 = vector.broadcast %cst_7 : f32 to vector<16x1xf32>
    %13 = arith.divf %11, %12 : vector<16x1xf32>
    %cst_8 = arith.constant 9.99999974E-6 : f32
    %14 = vector.broadcast %cst_8 : f32 to vector<16x1xf32>
    %15 = arith.addf %13, %14 : vector<16x1xf32>
    %16 = math.rsqrt %15 : vector<16x1xf32>
    %17 = vector.broadcast %16 : vector<16x1xf32> to vector<16x32xf32>
    %18 = arith.mulf %8, %17 : vector<16x32xf32>
    %19 = vector.broadcast %1 : vector<1x32xf32> to vector<16x32xf32>
    %20 = arith.mulf %18, %19 : vector<16x32xf32>
    %21 = vector.broadcast %2 : vector<1x32xf32> to vector<16x32xf32>
    %22 = arith.addf %20, %21 : vector<16x32xf32>
    %c0_9 = arith.constant 0 : index
    %c0_10 = arith.constant 0 : index
    %23 = vector.load %arg3[%c0_9, %c0_10] : memref<16x32xf32, #tpu.memory_space<vmem>>, vector<16x32xf32>
    tpu.vector_store %arg3[%c0_9, %c0_10], %22 {strides = array<i32>} : memref<16x32xf32, #tpu.memory_space<vmem>>, vector<16x32xf32>,
    return
  }
}

module attributes {stable_mosaic.version = 11 : i64} {
  func.func @_encoder_layer_kernel(%arg0: memref<16x32xf32, #tpu.memory_space<vmem>>, %arg1: memref<2x8xf32, #tpu.memory_space<vmem>>, %arg2: memref<32x96xf32, #tpu.memory_space<vmem>>, %arg3: memref<1x96xf32, #tpu.memory_space<vmem>>, %arg4: memref<32x32xf32, #tpu.memory_space<vmem>>, %arg5: memref<1x32xf32, #tpu.memory_space<vmem>>, %arg6: memref<1x32xf32, #tpu.memory_space<vmem>>, %arg7: memref<1x32xf32, #tpu.memory_space<vmem>>, %arg8: memref<32x64xf32, #tpu.memory_space<vmem>>, %arg9: memref<1x64xf32, #tpu.memory_space<vmem>>, %arg10: memref<64x32xf32, #tpu.memory_space<vmem>>, %arg11: memref<1x32xf32, #tpu.memory_space<vmem>>, %arg12: memref<1x32xf32, #tpu.memory_space<vmem>>, %arg13: memref<1x32xf32, #tpu.memory_space<vmem>>, %arg14: memref<16x32xf32, #tpu.memory_space<vmem>>, %arg15: memref<16x32xf32, #tpu.memory_space<vmem>>) attributes {dimension_semantics = [], scalar_prefetch = 0 : i64, scratch_operands = 1 : i64, tpu.core_type = #tpu.core_type<tc>} {
    %c0 = arith.constant 0 : index
    %c0_0 = arith.constant 0 : index
    %0 = vector.load %arg0[%c0, %c0_0] : memref<16x32xf32, #tpu.memory_space<vmem>>, vector<16x32xf32>
    %1 = arith.truncf %0 : vector<16x32xf32> to vector<16x32xbf16>
    %c0_1 = arith.constant 0 : index
    %c0_2 = arith.constant 0 : index
    %2 = vector.load %arg2[%c0_1, %c0_2] : memref<32x96xf32, #tpu.memory_space<vmem>>, vector<32x96xf32>
    %3 = arith.truncf %2 : vector<32x96xf32> to vector<32x96xbf16>
    %cst = arith.constant dense<0.000000e+00> : vector<16x96xf32>
    %4 = tpu.matmul %1, %3, %cst {dimension_numbers = #tpu.dot_dimension_numbers<[1], [0], [0], [1], [0, 0, 1, 1], [], []>} : vector<16x32xbf16>, vector<32x96xbf16>, vector<16x96xf32> -> vector<16x96xf32>
    %c0_3 = arith.constant 0 : index
    %c0_4 = arith.constant 0 : index
    %5 = vector.load %arg3[%c0_3, %c0_4] : memref<1x96xf32, #tpu.memory_space<vmem>>, vector<1x96xf32>
    %6 = vector.broadcast %5 : vector<1x96xf32> to vector<16x96xf32>
    %7 = arith.addf %4, %6 : vector<16x96xf32>
    %8 = vector.extract_strided_slice %7 {offsets = [0, 0], sizes = [16, 32], strides = [1, 1]} : vector<16x96xf32> to vector<16x32xf32>
    %9 = vector.extract_strided_slice %7 {offsets = [0, 32], sizes = [16, 32], strides = [1, 1]} : vector<16x96xf32> to vector<16x32xf32>
    %10 = vector.extract_strided_slice %7 {offsets = [0, 64], sizes = [16, 32], strides = [1, 1]} : vector<16x96xf32> to vector<16x32xf32>
    %c0_5 = arith.constant 0 : index
    %c0_6 = arith.constant 0 : index
    %11 = vector.load %arg1[%c0_5, %c0_6] : memref<2x8xf32, #tpu.memory_space<vmem>>, vector<2x8xf32>
    %12 = vector.extract_strided_slice %11 {offsets = [0, 0], sizes = [1, 8], strides = [1, 1]} : vector<2x8xf32> to vector<1x8xf32>
    %13 = vector.extract_strided_slice %8 {offsets = [0, 0], sizes = [8, 16], strides = [1, 1]} : vector<16x32xf32> to vector<8x16xf32>
    %14 = vector.extract_strided_slice %9 {offsets = [0, 0], sizes = [8, 16], strides = [1, 1]} : vector<16x32xf32> to vector<8x16xf32>
    %15 = vector.extract_strided_slice %10 {offsets = [0, 0], sizes = [8, 16], strides = [1, 1]} : vector<16x32xf32> to vector<8x16xf32>
    %cst_7 = arith.constant dense<0.000000e+00> : vector<8x8xf32>
    %16 = tpu.matmul %13, %14, %cst_7 {dimension_numbers = #tpu.dot_dimension_numbers<[1], [1], [0], [0], [0, 0, 1, 0], [], []>} : vector<8x16xf32>, vector<8x16xf32>, vector<8x8xf32> -> vector<8x8xf32>
    %cst_8 = arith.constant 2.500000e-01 : f32
    %17 = vector.broadcast %cst_8 : f32 to vector<8x8xf32>
    %18 = arith.mulf %16, %17 : vector<8x8xf32>
    %19 = vector.broadcast %12 : vector<1x8xf32> to vector<8x8xf32>
    %20 = arith.addf %18, %19 : vector<8x8xf32>
    %cst_9 = arith.constant dense<0xFF800000> : vector<8xf32>
    %21 = vector.multi_reduction <maximumf>, %20, %cst_9 [1] : vector<8x8xf32> to vector<8xf32>
    %22 = vector.shape_cast %21 : vector<8xf32> to vector<8x1xf32>
    %23 = vector.broadcast %22 : vector<8x1xf32> to vector<8x8xf32>
    %24 = arith.subf %20, %23 : vector<8x8xf32>
    %25 = math.exp %24 : vector<8x8xf32>
    %cst_10 = arith.constant dense<0.000000e+00> : vector<8xf32>
    %26 = vector.multi_reduction <add>, %25, %cst_10 [1] : vector<8x8xf32> to vector<8xf32>
    %27 = vector.shape_cast %26 : vector<8xf32> to vector<8x1xf32>
    %28 = tpu.reciprocal %27 {approx = true} : vector<8x1xf32> -> vector<8x1xf32>
    %29 = vector.broadcast %28 : vector<8x1xf32> to vector<8x8xf32>
    %30 = arith.mulf %25, %29 : vector<8x8xf32>
    %cst_11 = arith.constant dense<0.000000e+00> : vector<8x16xf32>
    %31 = tpu.matmul %30, %15, %cst_11 {dimension_numbers = #tpu.dot_dimension_numbers<[1], [0], [0], [1], [0, 0, 1, 1], [], []>} : vector<8x8xf32>, vector<8x16xf32>, vector<8x16xf32> -> vector<8x16xf32>
    %c0_12 = arith.constant 0 : index
    %c0_13 = arith.constant 0 : index
    %32 = vector.load %arg15[%c0_12, %c0_13] : memref<16x32xf32, #tpu.memory_space<vmem>>, vector<8x16xf32>
    tpu.vector_store %arg15[%c0_12, %c0_13], %31 {strides = array<i32>} : memref<16x32xf32, #tpu.memory_space<vmem>>, vector<8x16xf32>,
    %33 = vector.extract_strided_slice %8 {offsets = [0, 16], sizes = [8, 16], strides = [1, 1]} : vector<16x32xf32> to vector<8x16xf32>
    %34 = vector.extract_strided_slice %9 {offsets = [0, 16], sizes = [8, 16], strides = [1, 1]} : vector<16x32xf32> to vector<8x16xf32>
    %35 = vector.extract_strided_slice %10 {offsets = [0, 16], sizes = [8, 16], strides = [1, 1]} : vector<16x32xf32> to vector<8x16xf32>
    %cst_14 = arith.constant dense<0.000000e+00> : vector<8x8xf32>
    %36 = tpu.matmul %33, %34, %cst_14 {dimension_numbers = #tpu.dot_dimension_numbers<[1], [1], [0], [0], [0, 0, 1, 0], [], []>} : vector<8x16xf32>, vector<8x16xf32>, vector<8x8xf32> -> vector<8x8xf32>
    %cst_15 = arith.constant 2.500000e-01 : f32
    %37 = vector.broadcast %cst_15 : f32 to vector<8x8xf32>
    %38 = arith.mulf %36, %37 : vector<8x8xf32>
    %39 = vector.broadcast %12 : vector<1x8xf32> to vector<8x8xf32>
    %40 = arith.addf %38, %39 : vector<8x8xf32>
    %cst_16 = arith.constant dense<0xFF800000> : vector<8xf32>
    %41 = vector.multi_reduction <maximumf>, %40, %cst_16 [1] : vector<8x8xf32> to vector<8xf32>
    %42 = vector.shape_cast %41 : vector<8xf32> to vector<8x1xf32>
    %43 = vector.broadcast %42 : vector<8x1xf32> to vector<8x8xf32>
    %44 = arith.subf %40, %43 : vector<8x8xf32>
    %45 = math.exp %44 : vector<8x8xf32>
    %cst_17 = arith.constant dense<0.000000e+00> : vector<8xf32>
    %46 = vector.multi_reduction <add>, %45, %cst_17 [1] : vector<8x8xf32> to vector<8xf32>
    %47 = vector.shape_cast %46 : vector<8xf32> to vector<8x1xf32>
    %48 = tpu.reciprocal %47 {approx = true} : vector<8x1xf32> -> vector<8x1xf32>
    %49 = vector.broadcast %48 : vector<8x1xf32> to vector<8x8xf32>
    %50 = arith.mulf %45, %49 : vector<8x8xf32>
    %cst_18 = arith.constant dense<0.000000e+00> : vector<8x16xf32>
    %51 = tpu.matmul %50, %35, %cst_18 {dimension_numbers = #tpu.dot_dimension_numbers<[1], [0], [0], [1], [0, 0, 1, 1], [], []>} : vector<8x8xf32>, vector<8x16xf32>, vector<8x16xf32> -> vector<8x16xf32>
    %c0_19 = arith.constant 0 : index
    %c16 = arith.constant 16 : index
    %52 = vector.load %arg15[%c0_19, %c16] : memref<16x32xf32, #tpu.memory_space<vmem>>, vector<8x16xf32>
    tpu.vector_store %arg15[%c0_19, %c16], %51 {strides = array<i32>} : memref<16x32xf32, #tpu.memory_space<vmem>>, vector<8x16xf32>,
    %53 = vector.extract_strided_slice %11 {offsets = [1, 0], sizes = [1, 8], strides = [1, 1]} : vector<2x8xf32> to vector<1x8xf32>
    %54 = vector.extract_strided_slice %8 {offsets = [8, 0], sizes = [8, 16], strides = [1, 1]} : vector<16x32xf32> to vector<8x16xf32>
    %55 = vector.extract_strided_slice %9 {offsets = [8, 0], sizes = [8, 16], strides = [1, 1]} : vector<16x32xf32> to vector<8x16xf32>
    %56 = vector.extract_strided_slice %10 {offsets = [8, 0], sizes = [8, 16], strides = [1, 1]} : vector<16x32xf32> to vector<8x16xf32>
    %cst_20 = arith.constant dense<0.000000e+00> : vector<8x8xf32>
    %57 = tpu.matmul %54, %55, %cst_20 {dimension_numbers = #tpu.dot_dimension_numbers<[1], [1], [0], [0], [0, 0, 1, 0], [], []>} : vector<8x16xf32>, vector<8x16xf32>, vector<8x8xf32> -> vector<8x8xf32>
    %cst_21 = arith.constant 2.500000e-01 : f32
    %58 = vector.broadcast %cst_21 : f32 to vector<8x8xf32>
    %59 = arith.mulf %57, %58 : vector<8x8xf32>
    %60 = vector.broadcast %53 : vector<1x8xf32> to vector<8x8xf32>
    %61 = arith.addf %59, %60 : vector<8x8xf32>
    %cst_22 = arith.constant dense<0xFF800000> : vector<8xf32>
    %62 = vector.multi_reduction <maximumf>, %61, %cst_22 [1] : vector<8x8xf32> to vector<8xf32>
    %63 = vector.shape_cast %62 : vector<8xf32> to vector<8x1xf32>
    %64 = vector.broadcast %63 : vector<8x1xf32> to vector<8x8xf32>
    %65 = arith.subf %61, %64 : vector<8x8xf32>
    %66 = math.exp %65 : vector<8x8xf32>
    %cst_23 = arith.constant dense<0.000000e+00> : vector<8xf32>
    %67 = vector.multi_reduction <add>, %66, %cst_23 [1] : vector<8x8xf32> to vector<8xf32>
    %68 = vector.shape_cast %67 : vector<8xf32> to vector<8x1xf32>
    %69 = tpu.reciprocal %68 {approx = true} : vector<8x1xf32> -> vector<8x1xf32>
    %70 = vector.broadcast %69 : vector<8x1xf32> to vector<8x8xf32>
    %71 = arith.mulf %66, %70 : vector<8x8xf32>
    %cst_24 = arith.constant dense<0.000000e+00> : vector<8x16xf32>
    %72 = tpu.matmul %71, %56, %cst_24 {dimension_numbers = #tpu.dot_dimension_numbers<[1], [0], [0], [1], [0, 0, 1, 1], [], []>} : vector<8x8xf32>, vector<8x16xf32>, vector<8x16xf32> -> vector<8x16xf32>
    %c8 = arith.constant 8 : index
    %c0_25 = arith.constant 0 : index
    %73 = vector.load %arg15[%c8, %c0_25] : memref<16x32xf32, #tpu.memory_space<vmem>>, vector<8x16xf32>
    tpu.vector_store %arg15[%c8, %c0_25], %72 {strides = array<i32>} : memref<16x32xf32, #tpu.memory_space<vmem>>, vector<8x16xf32>,
    %74 = vector.extract_strided_slice %8 {offsets = [8, 16], sizes = [8, 16], strides = [1, 1]} : vector<16x32xf32> to vector<8x16xf32>
    %75 = vector.extract_strided_slice %9 {offsets = [8, 16], sizes = [8, 16], strides = [1, 1]} : vector<16x32xf32> to vector<8x16xf32>
    %76 = vector.extract_strided_slice %10 {offsets = [8, 16], sizes = [8, 16], strides = [1, 1]} : vector<16x32xf32> to vector<8x16xf32>
    %cst_26 = arith.constant dense<0.000000e+00> : vector<8x8xf32>
    %77 = tpu.matmul %74, %75, %cst_26 {dimension_numbers = #tpu.dot_dimension_numbers<[1], [1], [0], [0], [0, 0, 1, 0], [], []>} : vector<8x16xf32>, vector<8x16xf32>, vector<8x8xf32> -> vector<8x8xf32>
    %cst_27 = arith.constant 2.500000e-01 : f32
    %78 = vector.broadcast %cst_27 : f32 to vector<8x8xf32>
    %79 = arith.mulf %77, %78 : vector<8x8xf32>
    %80 = vector.broadcast %53 : vector<1x8xf32> to vector<8x8xf32>
    %81 = arith.addf %79, %80 : vector<8x8xf32>
    %cst_28 = arith.constant dense<0xFF800000> : vector<8xf32>
    %82 = vector.multi_reduction <maximumf>, %81, %cst_28 [1] : vector<8x8xf32> to vector<8xf32>
    %83 = vector.shape_cast %82 : vector<8xf32> to vector<8x1xf32>
    %84 = vector.broadcast %83 : vector<8x1xf32> to vector<8x8xf32>
    %85 = arith.subf %81, %84 : vector<8x8xf32>
    %86 = math.exp %85 : vector<8x8xf32>
    %cst_29 = arith.constant dense<0.000000e+00> : vector<8xf32>
    %87 = vector.multi_reduction <add>, %86, %cst_29 [1] : vector<8x8xf32> to vector<8xf32>
    %88 = vector.shape_cast %87 : vector<8xf32> to vector<8x1xf32>
    %89 = tpu.reciprocal %88 {approx = true} : vector<8x1xf32> -> vector<8x1xf32>
    %90 = vector.broadcast %89 : vector<8x1xf32> to vector<8x8xf32>
    %91 = arith.mulf %86, %90 : vector<8x8xf32>
    %cst_30 = arith.constant dense<0.000000e+00> : vector<8x16xf32>
    %92 = tpu.matmul %91, %76, %cst_30 {dimension_numbers = #tpu.dot_dimension_numbers<[1], [0], [0], [1], [0, 0, 1, 1], [], []>} : vector<8x8xf32>, vector<8x16xf32>, vector<8x16xf32> -> vector<8x16xf32>
    %c8_31 = arith.constant 8 : index
    %c16_32 = arith.constant 16 : index
    %93 = vector.load %arg15[%c8_31, %c16_32] : memref<16x32xf32, #tpu.memory_space<vmem>>, vector<8x16xf32>
    tpu.vector_store %arg15[%c8_31, %c16_32], %92 {strides = array<i32>} : memref<16x32xf32, #tpu.memory_space<vmem>>, vector<8x16xf32>,
    %c0_33 = arith.constant 0 : index
    %c0_34 = arith.constant 0 : index
    %94 = vector.load %arg15[%c0_33, %c0_34] : memref<16x32xf32, #tpu.memory_space<vmem>>, vector<16x32xf32>
    %95 = arith.truncf %94 : vector<16x32xf32> to vector<16x32xbf16>
    %c0_35 = arith.constant 0 : index
    %c0_36 = arith.constant 0 : index
    %96 = vector.load %arg4[%c0_35, %c0_36] : memref<32x32xf32, #tpu.memory_space<vmem>>, vector<32x32xf32>
    %97 = arith.truncf %96 : vector<32x32xf32> to vector<32x32xbf16>
    %cst_37 = arith.constant dense<0.000000e+00> : vector<16x32xf32>
    %98 = tpu.matmul %95, %97, %cst_37 {dimension_numbers = #tpu.dot_dimension_numbers<[1], [0], [0], [1], [0, 0, 1, 1], [], []>} : vector<16x32xbf16>, vector<32x32xbf16>, vector<16x32xf32> -> vector<16x32xf32>
    %c0_38 = arith.constant 0 : index
    %c0_39 = arith.constant 0 : index
    %99 = vector.load %arg5[%c0_38, %c0_39] : memref<1x32xf32, #tpu.memory_space<vmem>>, vector<1x32xf32>
    %100 = vector.broadcast %99 : vector<1x32xf32> to vector<16x32xf32>
    %101 = arith.addf %98, %100 : vector<16x32xf32>
    %102 = arith.addf %101, %0 : vector<16x32xf32>
    %c0_40 = arith.constant 0 : index
    %c0_41 = arith.constant 0 : index
    %103 = vector.load %arg6[%c0_40, %c0_41] : memref<1x32xf32, #tpu.memory_space<vmem>>, vector<1x32xf32>
    %c0_42 = arith.constant 0 : index
    %c0_43 = arith.constant 0 : index
    %104 = vector.load %arg7[%c0_42, %c0_43] : memref<1x32xf32, #tpu.memory_space<vmem>>, vector<1x32xf32>
    %cst_44 = arith.constant dense<0.000000e+00> : vector<16xf32>
    %105 = vector.multi_reduction <add>, %102, %cst_44 [1] : vector<16x32xf32> to vector<16xf32>
    %106 = vector.shape_cast %105 : vector<16xf32> to vector<16x1xf32>
    %cst_45 = arith.constant 3.200000e+01 : f32
    %107 = vector.broadcast %cst_45 : f32 to vector<16x1xf32>
    %108 = arith.divf %106, %107 : vector<16x1xf32>
    %109 = vector.broadcast %108 : vector<16x1xf32> to vector<16x32xf32>
    %110 = arith.subf %102, %109 : vector<16x32xf32>
    %111 = arith.mulf %110, %110 : vector<16x32xf32>
    %cst_46 = arith.constant dense<0.000000e+00> : vector<16xf32>
    %112 = vector.multi_reduction <add>, %111, %cst_46 [1] : vector<16x32xf32> to vector<16xf32>
    %113 = vector.shape_cast %112 : vector<16xf32> to vector<16x1xf32>
    %cst_47 = arith.constant 3.200000e+01 : f32
    %114 = vector.broadcast %cst_47 : f32 to vector<16x1xf32>
    %115 = arith.divf %113, %114 : vector<16x1xf32>
    %cst_48 = arith.constant 9.99999974E-6 : f32
    %116 = vector.broadcast %cst_48 : f32 to vector<16x1xf32>
    %117 = arith.addf %115, %116 : vector<16x1xf32>
    %118 = math.rsqrt %117 : vector<16x1xf32>
    %119 = vector.broadcast %118 : vector<16x1xf32> to vector<16x32xf32>
    %120 = arith.mulf %110, %119 : vector<16x32xf32>
    %121 = vector.broadcast %103 : vector<1x32xf32> to vector<16x32xf32>
    %122 = arith.mulf %120, %121 : vector<16x32xf32>
    %123 = vector.broadcast %104 : vector<1x32xf32> to vector<16x32xf32>
    %124 = arith.addf %122, %123 : vector<16x32xf32>
    %125 = arith.truncf %124 : vector<16x32xf32> to vector<16x32xbf16>
    %c0_49 = arith.constant 0 : index
    %c0_50 = arith.constant 0 : index
    %126 = vector.load %arg8[%c0_49, %c0_50] : memref<32x64xf32, #tpu.memory_space<vmem>>, vector<32x64xf32>
    %127 = arith.truncf %126 : vector<32x64xf32> to vector<32x64xbf16>
    %cst_51 = arith.constant dense<0.000000e+00> : vector<16x64xf32>
    %128 = tpu.matmul %125, %127, %cst_51 {dimension_numbers = #tpu.dot_dimension_numbers<[1], [0], [0], [1], [0, 0, 1, 1], [], []>} : vector<16x32xbf16>, vector<32x64xbf16>, vector<16x64xf32> -> vector<16x64xf32>
    %c0_52 = arith.constant 0 : index
    %c0_53 = arith.constant 0 : index
    %129 = vector.load %arg9[%c0_52, %c0_53] : memref<1x64xf32, #tpu.memory_space<vmem>>, vector<1x64xf32>
    %130 = vector.broadcast %129 : vector<1x64xf32> to vector<16x64xf32>
    %131 = arith.addf %128, %130 : vector<16x64xf32>
    %132 = arith.mulf %131, %131 : vector<16x64xf32>
    %133 = arith.mulf %131, %132 : vector<16x64xf32>
    %cst_54 = arith.constant 4.471500e-02 : f32
    %134 = vector.broadcast %cst_54 : f32 to vector<16x64xf32>
    %135 = arith.mulf %134, %133 : vector<16x64xf32>
    %136 = arith.addf %131, %135 : vector<16x64xf32>
    %cst_55 = arith.constant 0.797884583 : f32
    %137 = vector.broadcast %cst_55 : f32 to vector<16x64xf32>
    %138 = arith.mulf %137, %136 : vector<16x64xf32>
    %139 = math.tanh %138 : vector<16x64xf32>
    %cst_56 = arith.constant 1.000000e+00 : f32
    %140 = vector.broadcast %cst_56 : f32 to vector<16x64xf32>
    %141 = arith.addf %140, %139 : vector<16x64xf32>
    %cst_57 = arith.constant 5.000000e-01 : f32
    %142 = vector.broadcast %cst_57 : f32 to vector<16x64xf32>
    %143 = arith.mulf %142, %141 : vector<16x64xf32>
    %144 = arith.mulf %131, %143 : vector<16x64xf32>
    %145 = arith.truncf %144 : vector<16x64xf32> to vector<16x64xbf16>
    %c0_58 = arith.constant 0 : index
    %c0_59 = arith.constant 0 : index
    %146 = vector.load %arg10[%c0_58, %c0_59] : memref<64x32xf32, #tpu.memory_space<vmem>>, vector<64x32xf32>
    %147 = arith.truncf %146 : vector<64x32xf32> to vector<64x32xbf16>
    %cst_60 = arith.constant dense<0.000000e+00> : vector<16x32xf32>
    %148 = tpu.matmul %145, %147, %cst_60 {dimension_numbers = #tpu.dot_dimension_numbers<[1], [0], [0], [1], [0, 0, 1, 1], [], []>} : vector<16x64xbf16>, vector<64x32xbf16>, vector<16x32xf32> -> vector<16x32xf32>
    %c0_61 = arith.constant 0 : index
    %c0_62 = arith.constant 0 : index
    %149 = vector.load %arg11[%c0_61, %c0_62] : memref<1x32xf32, #tpu.memory_space<vmem>>, vector<1x32xf32>
    %150 = vector.broadcast %149 : vector<1x32xf32> to vector<16x32xf32>
    %151 = arith.addf %148, %150 : vector<16x32xf32>
    %152 = arith.addf %151, %124 : vector<16x32xf32>
    %c0_63 = arith.constant 0 : index
    %c0_64 = arith.constant 0 : index
    %153 = vector.load %arg12[%c0_63, %c0_64] : memref<1x32xf32, #tpu.memory_space<vmem>>, vector<1x32xf32>
    %c0_65 = arith.constant 0 : index
    %c0_66 = arith.constant 0 : index
    %154 = vector.load %arg13[%c0_65, %c0_66] : memref<1x32xf32, #tpu.memory_space<vmem>>, vector<1x32xf32>
    %cst_67 = arith.constant dense<0.000000e+00> : vector<16xf32>
    %155 = vector.multi_reduction <add>, %152, %cst_67 [1] : vector<16x32xf32> to vector<16xf32>
    %156 = vector.shape_cast %155 : vector<16xf32> to vector<16x1xf32>
    %cst_68 = arith.constant 3.200000e+01 : f32
    %157 = vector.broadcast %cst_68 : f32 to vector<16x1xf32>
    %158 = arith.divf %156, %157 : vector<16x1xf32>
    %159 = vector.broadcast %158 : vector<16x1xf32> to vector<16x32xf32>
    %160 = arith.subf %152, %159 : vector<16x32xf32>
    %161 = arith.mulf %160, %160 : vector<16x32xf32>
    %cst_69 = arith.constant dense<0.000000e+00> : vector<16xf32>
    %162 = vector.multi_reduction <add>, %161, %cst_69 [1] : vector<16x32xf32> to vector<16xf32>
    %163 = vector.shape_cast %162 : vector<16xf32> to vector<16x1xf32>
    %cst_70 = arith.constant 3.200000e+01 : f32
    %164 = vector.broadcast %cst_70 : f32 to vector<16x1xf32>
    %165 = arith.divf %163, %164 : vector<16x1xf32>
    %cst_71 = arith.constant 9.99999974E-6 : f32
    %166 = vector.broadcast %cst_71 : f32 to vector<16x1xf32>
    %167 = arith.addf %165, %166 : vector<16x1xf32>
    %168 = math.rsqrt %167 : vector<16x1xf32>
    %169 = vector.broadcast %168 : vector<16x1xf32> to vector<16x32xf32>
    %170 = arith.mulf %160, %169 : vector<16x32xf32>
    %171 = vector.broadcast %153 : vector<1x32xf32> to vector<16x32xf32>
    %172 = arith.mulf %170, %171 : vector<16x32xf32>
    %173 = vector.broadcast %154 : vector<1x32xf32> to vector<16x32xf32>
    %174 = arith.addf %172, %173 : vector<16x32xf32>
    %c0_72 = arith.constant 0 : index
    %c0_73 = arith.constant 0 : index
    %175 = vector.load %arg14[%c0_72, %c0_73] : memref<16x32xf32, #tpu.memory_space<vmem>>, vector<16x32xf32>
    tpu.vector_store %arg14[%c0_72, %c0_73], %174 {strides = array<i32>} : memref<16x32xf32, #tpu.memory_space<vmem>>, vector<16x32xf32>,
    return
  }
}

module attributes {stable_mosaic.version = 11 : i64} {
  func.func @_encoder_layer_kernel(%arg0: memref<16x32xf32, #tpu.memory_space<vmem>>, %arg1: memref<2x8xf32, #tpu.memory_space<vmem>>, %arg2: memref<32x96xf32, #tpu.memory_space<vmem>>, %arg3: memref<1x96xf32, #tpu.memory_space<vmem>>, %arg4: memref<32x32xf32, #tpu.memory_space<vmem>>, %arg5: memref<1x32xf32, #tpu.memory_space<vmem>>, %arg6: memref<1x32xf32, #tpu.memory_space<vmem>>, %arg7: memref<1x32xf32, #tpu.memory_space<vmem>>, %arg8: memref<32x64xf32, #tpu.memory_space<vmem>>, %arg9: memref<1x64xf32, #tpu.memory_space<vmem>>, %arg10: memref<64x32xf32, #tpu.memory_space<vmem>>, %arg11: memref<1x32xf32, #tpu.memory_space<vmem>>, %arg12: memref<1x32xf32, #tpu.memory_space<vmem>>, %arg13: memref<1x32xf32, #tpu.memory_space<vmem>>, %arg14: memref<32x2xf32, #tpu.memory_space<vmem>>, %arg15: memref<1x2xf32, #tpu.memory_space<vmem>>, %arg16: memref<16x32xf32, #tpu.memory_space<vmem>>, %arg17: memref<16x2xf32, #tpu.memory_space<vmem>>, %arg18: memref<16x32xf32, #tpu.memory_space<vmem>>) attributes {dimension_semantics = [], scalar_prefetch = 0 : i64, scratch_operands = 1 : i64, tpu.core_type = #tpu.core_type<tc>} {
    %c0 = arith.constant 0 : index
    %c0_0 = arith.constant 0 : index
    %0 = vector.load %arg0[%c0, %c0_0] : memref<16x32xf32, #tpu.memory_space<vmem>>, vector<16x32xf32>
    %1 = arith.truncf %0 : vector<16x32xf32> to vector<16x32xbf16>
    %c0_1 = arith.constant 0 : index
    %c0_2 = arith.constant 0 : index
    %2 = vector.load %arg2[%c0_1, %c0_2] : memref<32x96xf32, #tpu.memory_space<vmem>>, vector<32x96xf32>
    %3 = arith.truncf %2 : vector<32x96xf32> to vector<32x96xbf16>
    %cst = arith.constant dense<0.000000e+00> : vector<16x96xf32>
    %4 = tpu.matmul %1, %3, %cst {dimension_numbers = #tpu.dot_dimension_numbers<[1], [0], [0], [1], [0, 0, 1, 1], [], []>} : vector<16x32xbf16>, vector<32x96xbf16>, vector<16x96xf32> -> vector<16x96xf32>
    %c0_3 = arith.constant 0 : index
    %c0_4 = arith.constant 0 : index
    %5 = vector.load %arg3[%c0_3, %c0_4] : memref<1x96xf32, #tpu.memory_space<vmem>>, vector<1x96xf32>
    %6 = vector.broadcast %5 : vector<1x96xf32> to vector<16x96xf32>
    %7 = arith.addf %4, %6 : vector<16x96xf32>
    %8 = vector.extract_strided_slice %7 {offsets = [0, 0], sizes = [16, 32], strides = [1, 1]} : vector<16x96xf32> to vector<16x32xf32>
    %9 = vector.extract_strided_slice %7 {offsets = [0, 32], sizes = [16, 32], strides = [1, 1]} : vector<16x96xf32> to vector<16x32xf32>
    %10 = vector.extract_strided_slice %7 {offsets = [0, 64], sizes = [16, 32], strides = [1, 1]} : vector<16x96xf32> to vector<16x32xf32>
    %c0_5 = arith.constant 0 : index
    %c0_6 = arith.constant 0 : index
    %11 = vector.load %arg1[%c0_5, %c0_6] : memref<2x8xf32, #tpu.memory_space<vmem>>, vector<2x8xf32>
    %12 = vector.extract_strided_slice %11 {offsets = [0, 0], sizes = [1, 8], strides = [1, 1]} : vector<2x8xf32> to vector<1x8xf32>
    %13 = vector.extract_strided_slice %8 {offsets = [0, 0], sizes = [8, 16], strides = [1, 1]} : vector<16x32xf32> to vector<8x16xf32>
    %14 = vector.extract_strided_slice %9 {offsets = [0, 0], sizes = [8, 16], strides = [1, 1]} : vector<16x32xf32> to vector<8x16xf32>
    %15 = vector.extract_strided_slice %10 {offsets = [0, 0], sizes = [8, 16], strides = [1, 1]} : vector<16x32xf32> to vector<8x16xf32>
    %cst_7 = arith.constant dense<0.000000e+00> : vector<8x8xf32>
    %16 = tpu.matmul %13, %14, %cst_7 {dimension_numbers = #tpu.dot_dimension_numbers<[1], [1], [0], [0], [0, 0, 1, 0], [], []>} : vector<8x16xf32>, vector<8x16xf32>, vector<8x8xf32> -> vector<8x8xf32>
    %cst_8 = arith.constant 2.500000e-01 : f32
    %17 = vector.broadcast %cst_8 : f32 to vector<8x8xf32>
    %18 = arith.mulf %16, %17 : vector<8x8xf32>
    %19 = vector.broadcast %12 : vector<1x8xf32> to vector<8x8xf32>
    %20 = arith.addf %18, %19 : vector<8x8xf32>
    %cst_9 = arith.constant dense<0xFF800000> : vector<8xf32>
    %21 = vector.multi_reduction <maximumf>, %20, %cst_9 [1] : vector<8x8xf32> to vector<8xf32>
    %22 = vector.shape_cast %21 : vector<8xf32> to vector<8x1xf32>
    %23 = vector.broadcast %22 : vector<8x1xf32> to vector<8x8xf32>
    %24 = arith.subf %20, %23 : vector<8x8xf32>
    %25 = math.exp %24 : vector<8x8xf32>
    %cst_10 = arith.constant dense<0.000000e+00> : vector<8xf32>
    %26 = vector.multi_reduction <add>, %25, %cst_10 [1] : vector<8x8xf32> to vector<8xf32>
    %27 = vector.shape_cast %26 : vector<8xf32> to vector<8x1xf32>
    %28 = tpu.reciprocal %27 {approx = true} : vector<8x1xf32> -> vector<8x1xf32>
    %29 = vector.broadcast %28 : vector<8x1xf32> to vector<8x8xf32>
    %30 = arith.mulf %25, %29 : vector<8x8xf32>
    %cst_11 = arith.constant dense<0.000000e+00> : vector<8x16xf32>
    %31 = tpu.matmul %30, %15, %cst_11 {dimension_numbers = #tpu.dot_dimension_numbers<[1], [0], [0], [1], [0, 0, 1, 1], [], []>} : vector<8x8xf32>, vector<8x16xf32>, vector<8x16xf32> -> vector<8x16xf32>
    %c0_12 = arith.constant 0 : index
    %c0_13 = arith.constant 0 : index
    %32 = vector.load %arg18[%c0_12, %c0_13] : memref<16x32xf32, #tpu.memory_space<vmem>>, vector<8x16xf32>
    tpu.vector_store %arg18[%c0_12, %c0_13], %31 {strides = array<i32>} : memref<16x32xf32, #tpu.memory_space<vmem>>, vector<8x16xf32>,
    %33 = vector.extract_strided_slice %8 {offsets = [0, 16], sizes = [8, 16], strides = [1, 1]} : vector<16x32xf32> to vector<8x16xf32>
    %34 = vector.extract_strided_slice %9 {offsets = [0, 16], sizes = [8, 16], strides = [1, 1]} : vector<16x32xf32> to vector<8x16xf32>
    %35 = vector.extract_strided_slice %10 {offsets = [0, 16], sizes = [8, 16], strides = [1, 1]} : vector<16x32xf32> to vector<8x16xf32>
    %cst_14 = arith.constant dense<0.000000e+00> : vector<8x8xf32>
    %36 = tpu.matmul %33, %34, %cst_14 {dimension_numbers = #tpu.dot_dimension_numbers<[1], [1], [0], [0], [0, 0, 1, 0], [], []>} : vector<8x16xf32>, vector<8x16xf32>, vector<8x8xf32> -> vector<8x8xf32>
    %cst_15 = arith.constant 2.500000e-01 : f32
    %37 = vector.broadcast %cst_15 : f32 to vector<8x8xf32>
    %38 = arith.mulf %36, %37 : vector<8x8xf32>
    %39 = vector.broadcast %12 : vector<1x8xf32> to vector<8x8xf32>
    %40 = arith.addf %38, %39 : vector<8x8xf32>
    %cst_16 = arith.constant dense<0xFF800000> : vector<8xf32>
    %41 = vector.multi_reduction <maximumf>, %40, %cst_16 [1] : vector<8x8xf32> to vector<8xf32>
    %42 = vector.shape_cast %41 : vector<8xf32> to vector<8x1xf32>
    %43 = vector.broadcast %42 : vector<8x1xf32> to vector<8x8xf32>
    %44 = arith.subf %40, %43 : vector<8x8xf32>
    %45 = math.exp %44 : vector<8x8xf32>
    %cst_17 = arith.constant dense<0.000000e+00> : vector<8xf32>
    %46 = vector.multi_reduction <add>, %45, %cst_17 [1] : vector<8x8xf32> to vector<8xf32>
    %47 = vector.shape_cast %46 : vector<8xf32> to vector<8x1xf32>
    %48 = tpu.reciprocal %47 {approx = true} : vector<8x1xf32> -> vector<8x1xf32>
    %49 = vector.broadcast %48 : vector<8x1xf32> to vector<8x8xf32>
    %50 = arith.mulf %45, %49 : vector<8x8xf32>
    %cst_18 = arith.constant dense<0.000000e+00> : vector<8x16xf32>
    %51 = tpu.matmul %50, %35, %cst_18 {dimension_numbers = #tpu.dot_dimension_numbers<[1], [0], [0], [1], [0, 0, 1, 1], [], []>} : vector<8x8xf32>, vector<8x16xf32>, vector<8x16xf32> -> vector<8x16xf32>
    %c0_19 = arith.constant 0 : index
    %c16 = arith.constant 16 : index
    %52 = vector.load %arg18[%c0_19, %c16] : memref<16x32xf32, #tpu.memory_space<vmem>>, vector<8x16xf32>
    tpu.vector_store %arg18[%c0_19, %c16], %51 {strides = array<i32>} : memref<16x32xf32, #tpu.memory_space<vmem>>, vector<8x16xf32>,
    %53 = vector.extract_strided_slice %11 {offsets = [1, 0], sizes = [1, 8], strides = [1, 1]} : vector<2x8xf32> to vector<1x8xf32>
    %54 = vector.extract_strided_slice %8 {offsets = [8, 0], sizes = [8, 16], strides = [1, 1]} : vector<16x32xf32> to vector<8x16xf32>
    %55 = vector.extract_strided_slice %9 {offsets = [8, 0], sizes = [8, 16], strides = [1, 1]} : vector<16x32xf32> to vector<8x16xf32>
    %56 = vector.extract_strided_slice %10 {offsets = [8, 0], sizes = [8, 16], strides = [1, 1]} : vector<16x32xf32> to vector<8x16xf32>
    %cst_20 = arith.constant dense<0.000000e+00> : vector<8x8xf32>
    %57 = tpu.matmul %54, %55, %cst_20 {dimension_numbers = #tpu.dot_dimension_numbers<[1], [1], [0], [0], [0, 0, 1, 0], [], []>} : vector<8x16xf32>, vector<8x16xf32>, vector<8x8xf32> -> vector<8x8xf32>
    %cst_21 = arith.constant 2.500000e-01 : f32
    %58 = vector.broadcast %cst_21 : f32 to vector<8x8xf32>
    %59 = arith.mulf %57, %58 : vector<8x8xf32>
    %60 = vector.broadcast %53 : vector<1x8xf32> to vector<8x8xf32>
    %61 = arith.addf %59, %60 : vector<8x8xf32>
    %cst_22 = arith.constant dense<0xFF800000> : vector<8xf32>
    %62 = vector.multi_reduction <maximumf>, %61, %cst_22 [1] : vector<8x8xf32> to vector<8xf32>
    %63 = vector.shape_cast %62 : vector<8xf32> to vector<8x1xf32>
    %64 = vector.broadcast %63 : vector<8x1xf32> to vector<8x8xf32>
    %65 = arith.subf %61, %64 : vector<8x8xf32>
    %66 = math.exp %65 : vector<8x8xf32>
    %cst_23 = arith.constant dense<0.000000e+00> : vector<8xf32>
    %67 = vector.multi_reduction <add>, %66, %cst_23 [1] : vector<8x8xf32> to vector<8xf32>
    %68 = vector.shape_cast %67 : vector<8xf32> to vector<8x1xf32>
    %69 = tpu.reciprocal %68 {approx = true} : vector<8x1xf32> -> vector<8x1xf32>
    %70 = vector.broadcast %69 : vector<8x1xf32> to vector<8x8xf32>
    %71 = arith.mulf %66, %70 : vector<8x8xf32>
    %cst_24 = arith.constant dense<0.000000e+00> : vector<8x16xf32>
    %72 = tpu.matmul %71, %56, %cst_24 {dimension_numbers = #tpu.dot_dimension_numbers<[1], [0], [0], [1], [0, 0, 1, 1], [], []>} : vector<8x8xf32>, vector<8x16xf32>, vector<8x16xf32> -> vector<8x16xf32>
    %c8 = arith.constant 8 : index
    %c0_25 = arith.constant 0 : index
    %73 = vector.load %arg18[%c8, %c0_25] : memref<16x32xf32, #tpu.memory_space<vmem>>, vector<8x16xf32>
    tpu.vector_store %arg18[%c8, %c0_25], %72 {strides = array<i32>} : memref<16x32xf32, #tpu.memory_space<vmem>>, vector<8x16xf32>,
    %74 = vector.extract_strided_slice %8 {offsets = [8, 16], sizes = [8, 16], strides = [1, 1]} : vector<16x32xf32> to vector<8x16xf32>
    %75 = vector.extract_strided_slice %9 {offsets = [8, 16], sizes = [8, 16], strides = [1, 1]} : vector<16x32xf32> to vector<8x16xf32>
    %76 = vector.extract_strided_slice %10 {offsets = [8, 16], sizes = [8, 16], strides = [1, 1]} : vector<16x32xf32> to vector<8x16xf32>
    %cst_26 = arith.constant dense<0.000000e+00> : vector<8x8xf32>
    %77 = tpu.matmul %74, %75, %cst_26 {dimension_numbers = #tpu.dot_dimension_numbers<[1], [1], [0], [0], [0, 0, 1, 0], [], []>} : vector<8x16xf32>, vector<8x16xf32>, vector<8x8xf32> -> vector<8x8xf32>
    %cst_27 = arith.constant 2.500000e-01 : f32
    %78 = vector.broadcast %cst_27 : f32 to vector<8x8xf32>
    %79 = arith.mulf %77, %78 : vector<8x8xf32>
    %80 = vector.broadcast %53 : vector<1x8xf32> to vector<8x8xf32>
    %81 = arith.addf %79, %80 : vector<8x8xf32>
    %cst_28 = arith.constant dense<0xFF800000> : vector<8xf32>
    %82 = vector.multi_reduction <maximumf>, %81, %cst_28 [1] : vector<8x8xf32> to vector<8xf32>
    %83 = vector.shape_cast %82 : vector<8xf32> to vector<8x1xf32>
    %84 = vector.broadcast %83 : vector<8x1xf32> to vector<8x8xf32>
    %85 = arith.subf %81, %84 : vector<8x8xf32>
    %86 = math.exp %85 : vector<8x8xf32>
    %cst_29 = arith.constant dense<0.000000e+00> : vector<8xf32>
    %87 = vector.multi_reduction <add>, %86, %cst_29 [1] : vector<8x8xf32> to vector<8xf32>
    %88 = vector.shape_cast %87 : vector<8xf32> to vector<8x1xf32>
    %89 = tpu.reciprocal %88 {approx = true} : vector<8x1xf32> -> vector<8x1xf32>
    %90 = vector.broadcast %89 : vector<8x1xf32> to vector<8x8xf32>
    %91 = arith.mulf %86, %90 : vector<8x8xf32>
    %cst_30 = arith.constant dense<0.000000e+00> : vector<8x16xf32>
    %92 = tpu.matmul %91, %76, %cst_30 {dimension_numbers = #tpu.dot_dimension_numbers<[1], [0], [0], [1], [0, 0, 1, 1], [], []>} : vector<8x8xf32>, vector<8x16xf32>, vector<8x16xf32> -> vector<8x16xf32>
    %c8_31 = arith.constant 8 : index
    %c16_32 = arith.constant 16 : index
    %93 = vector.load %arg18[%c8_31, %c16_32] : memref<16x32xf32, #tpu.memory_space<vmem>>, vector<8x16xf32>
    tpu.vector_store %arg18[%c8_31, %c16_32], %92 {strides = array<i32>} : memref<16x32xf32, #tpu.memory_space<vmem>>, vector<8x16xf32>,
    %c0_33 = arith.constant 0 : index
    %c0_34 = arith.constant 0 : index
    %94 = vector.load %arg18[%c0_33, %c0_34] : memref<16x32xf32, #tpu.memory_space<vmem>>, vector<16x32xf32>
    %95 = arith.truncf %94 : vector<16x32xf32> to vector<16x32xbf16>
    %c0_35 = arith.constant 0 : index
    %c0_36 = arith.constant 0 : index
    %96 = vector.load %arg4[%c0_35, %c0_36] : memref<32x32xf32, #tpu.memory_space<vmem>>, vector<32x32xf32>
    %97 = arith.truncf %96 : vector<32x32xf32> to vector<32x32xbf16>
    %cst_37 = arith.constant dense<0.000000e+00> : vector<16x32xf32>
    %98 = tpu.matmul %95, %97, %cst_37 {dimension_numbers = #tpu.dot_dimension_numbers<[1], [0], [0], [1], [0, 0, 1, 1], [], []>} : vector<16x32xbf16>, vector<32x32xbf16>, vector<16x32xf32> -> vector<16x32xf32>
    %c0_38 = arith.constant 0 : index
    %c0_39 = arith.constant 0 : index
    %99 = vector.load %arg5[%c0_38, %c0_39] : memref<1x32xf32, #tpu.memory_space<vmem>>, vector<1x32xf32>
    %100 = vector.broadcast %99 : vector<1x32xf32> to vector<16x32xf32>
    %101 = arith.addf %98, %100 : vector<16x32xf32>
    %102 = arith.addf %101, %0 : vector<16x32xf32>
    %c0_40 = arith.constant 0 : index
    %c0_41 = arith.constant 0 : index
    %103 = vector.load %arg6[%c0_40, %c0_41] : memref<1x32xf32, #tpu.memory_space<vmem>>, vector<1x32xf32>
    %c0_42 = arith.constant 0 : index
    %c0_43 = arith.constant 0 : index
    %104 = vector.load %arg7[%c0_42, %c0_43] : memref<1x32xf32, #tpu.memory_space<vmem>>, vector<1x32xf32>
    %cst_44 = arith.constant dense<0.000000e+00> : vector<16xf32>
    %105 = vector.multi_reduction <add>, %102, %cst_44 [1] : vector<16x32xf32> to vector<16xf32>
    %106 = vector.shape_cast %105 : vector<16xf32> to vector<16x1xf32>
    %cst_45 = arith.constant 3.200000e+01 : f32
    %107 = vector.broadcast %cst_45 : f32 to vector<16x1xf32>
    %108 = arith.divf %106, %107 : vector<16x1xf32>
    %109 = vector.broadcast %108 : vector<16x1xf32> to vector<16x32xf32>
    %110 = arith.subf %102, %109 : vector<16x32xf32>
    %111 = arith.mulf %110, %110 : vector<16x32xf32>
    %cst_46 = arith.constant dense<0.000000e+00> : vector<16xf32>
    %112 = vector.multi_reduction <add>, %111, %cst_46 [1] : vector<16x32xf32> to vector<16xf32>
    %113 = vector.shape_cast %112 : vector<16xf32> to vector<16x1xf32>
    %cst_47 = arith.constant 3.200000e+01 : f32
    %114 = vector.broadcast %cst_47 : f32 to vector<16x1xf32>
    %115 = arith.divf %113, %114 : vector<16x1xf32>
    %cst_48 = arith.constant 9.99999974E-6 : f32
    %116 = vector.broadcast %cst_48 : f32 to vector<16x1xf32>
    %117 = arith.addf %115, %116 : vector<16x1xf32>
    %118 = math.rsqrt %117 : vector<16x1xf32>
    %119 = vector.broadcast %118 : vector<16x1xf32> to vector<16x32xf32>
    %120 = arith.mulf %110, %119 : vector<16x32xf32>
    %121 = vector.broadcast %103 : vector<1x32xf32> to vector<16x32xf32>
    %122 = arith.mulf %120, %121 : vector<16x32xf32>
    %123 = vector.broadcast %104 : vector<1x32xf32> to vector<16x32xf32>
    %124 = arith.addf %122, %123 : vector<16x32xf32>
    %125 = arith.truncf %124 : vector<16x32xf32> to vector<16x32xbf16>
    %c0_49 = arith.constant 0 : index
    %c0_50 = arith.constant 0 : index
    %126 = vector.load %arg8[%c0_49, %c0_50] : memref<32x64xf32, #tpu.memory_space<vmem>>, vector<32x64xf32>
    %127 = arith.truncf %126 : vector<32x64xf32> to vector<32x64xbf16>
    %cst_51 = arith.constant dense<0.000000e+00> : vector<16x64xf32>
    %128 = tpu.matmul %125, %127, %cst_51 {dimension_numbers = #tpu.dot_dimension_numbers<[1], [0], [0], [1], [0, 0, 1, 1], [], []>} : vector<16x32xbf16>, vector<32x64xbf16>, vector<16x64xf32> -> vector<16x64xf32>
    %c0_52 = arith.constant 0 : index
    %c0_53 = arith.constant 0 : index
    %129 = vector.load %arg9[%c0_52, %c0_53] : memref<1x64xf32, #tpu.memory_space<vmem>>, vector<1x64xf32>
    %130 = vector.broadcast %129 : vector<1x64xf32> to vector<16x64xf32>
    %131 = arith.addf %128, %130 : vector<16x64xf32>
    %132 = arith.mulf %131, %131 : vector<16x64xf32>
    %133 = arith.mulf %131, %132 : vector<16x64xf32>
    %cst_54 = arith.constant 4.471500e-02 : f32
    %134 = vector.broadcast %cst_54 : f32 to vector<16x64xf32>
    %135 = arith.mulf %134, %133 : vector<16x64xf32>
    %136 = arith.addf %131, %135 : vector<16x64xf32>
    %cst_55 = arith.constant 0.797884583 : f32
    %137 = vector.broadcast %cst_55 : f32 to vector<16x64xf32>
    %138 = arith.mulf %137, %136 : vector<16x64xf32>
    %139 = math.tanh %138 : vector<16x64xf32>
    %cst_56 = arith.constant 1.000000e+00 : f32
    %140 = vector.broadcast %cst_56 : f32 to vector<16x64xf32>
    %141 = arith.addf %140, %139 : vector<16x64xf32>
    %cst_57 = arith.constant 5.000000e-01 : f32
    %142 = vector.broadcast %cst_57 : f32 to vector<16x64xf32>
    %143 = arith.mulf %142, %141 : vector<16x64xf32>
    %144 = arith.mulf %131, %143 : vector<16x64xf32>
    %145 = arith.truncf %144 : vector<16x64xf32> to vector<16x64xbf16>
    %c0_58 = arith.constant 0 : index
    %c0_59 = arith.constant 0 : index
    %146 = vector.load %arg10[%c0_58, %c0_59] : memref<64x32xf32, #tpu.memory_space<vmem>>, vector<64x32xf32>
    %147 = arith.truncf %146 : vector<64x32xf32> to vector<64x32xbf16>
    %cst_60 = arith.constant dense<0.000000e+00> : vector<16x32xf32>
    %148 = tpu.matmul %145, %147, %cst_60 {dimension_numbers = #tpu.dot_dimension_numbers<[1], [0], [0], [1], [0, 0, 1, 1], [], []>} : vector<16x64xbf16>, vector<64x32xbf16>, vector<16x32xf32> -> vector<16x32xf32>
    %c0_61 = arith.constant 0 : index
    %c0_62 = arith.constant 0 : index
    %149 = vector.load %arg11[%c0_61, %c0_62] : memref<1x32xf32, #tpu.memory_space<vmem>>, vector<1x32xf32>
    %150 = vector.broadcast %149 : vector<1x32xf32> to vector<16x32xf32>
    %151 = arith.addf %148, %150 : vector<16x32xf32>
    %152 = arith.addf %151, %124 : vector<16x32xf32>
    %c0_63 = arith.constant 0 : index
    %c0_64 = arith.constant 0 : index
    %153 = vector.load %arg12[%c0_63, %c0_64] : memref<1x32xf32, #tpu.memory_space<vmem>>, vector<1x32xf32>
    %c0_65 = arith.constant 0 : index
    %c0_66 = arith.constant 0 : index
    %154 = vector.load %arg13[%c0_65, %c0_66] : memref<1x32xf32, #tpu.memory_space<vmem>>, vector<1x32xf32>
    %cst_67 = arith.constant dense<0.000000e+00> : vector<16xf32>
    %155 = vector.multi_reduction <add>, %152, %cst_67 [1] : vector<16x32xf32> to vector<16xf32>
    %156 = vector.shape_cast %155 : vector<16xf32> to vector<16x1xf32>
    %cst_68 = arith.constant 3.200000e+01 : f32
    %157 = vector.broadcast %cst_68 : f32 to vector<16x1xf32>
    %158 = arith.divf %156, %157 : vector<16x1xf32>
    %159 = vector.broadcast %158 : vector<16x1xf32> to vector<16x32xf32>
    %160 = arith.subf %152, %159 : vector<16x32xf32>
    %161 = arith.mulf %160, %160 : vector<16x32xf32>
    %cst_69 = arith.constant dense<0.000000e+00> : vector<16xf32>
    %162 = vector.multi_reduction <add>, %161, %cst_69 [1] : vector<16x32xf32> to vector<16xf32>
    %163 = vector.shape_cast %162 : vector<16xf32> to vector<16x1xf32>
    %cst_70 = arith.constant 3.200000e+01 : f32
    %164 = vector.broadcast %cst_70 : f32 to vector<16x1xf32>
    %165 = arith.divf %163, %164 : vector<16x1xf32>
    %cst_71 = arith.constant 9.99999974E-6 : f32
    %166 = vector.broadcast %cst_71 : f32 to vector<16x1xf32>
    %167 = arith.addf %165, %166 : vector<16x1xf32>
    %168 = math.rsqrt %167 : vector<16x1xf32>
    %169 = vector.broadcast %168 : vector<16x1xf32> to vector<16x32xf32>
    %170 = arith.mulf %160, %169 : vector<16x32xf32>
    %171 = vector.broadcast %153 : vector<1x32xf32> to vector<16x32xf32>
    %172 = arith.mulf %170, %171 : vector<16x32xf32>
    %173 = vector.broadcast %154 : vector<1x32xf32> to vector<16x32xf32>
    %174 = arith.addf %172, %173 : vector<16x32xf32>
    %c0_72 = arith.constant 0 : index
    %c0_73 = arith.constant 0 : index
    %175 = vector.load %arg16[%c0_72, %c0_73] : memref<16x32xf32, #tpu.memory_space<vmem>>, vector<16x32xf32>
    tpu.vector_store %arg16[%c0_72, %c0_73], %174 {strides = array<i32>} : memref<16x32xf32, #tpu.memory_space<vmem>>, vector<16x32xf32>,
    %176 = arith.truncf %174 : vector<16x32xf32> to vector<16x32xbf16>
    %c0_74 = arith.constant 0 : index
    %c0_75 = arith.constant 0 : index
    %177 = vector.load %arg14[%c0_74, %c0_75] : memref<32x2xf32, #tpu.memory_space<vmem>>, vector<32x2xf32>
    %178 = arith.truncf %177 : vector<32x2xf32> to vector<32x2xbf16>
    %cst_76 = arith.constant dense<0.000000e+00> : vector<16x2xf32>
    %179 = tpu.matmul %176, %178, %cst_76 {dimension_numbers = #tpu.dot_dimension_numbers<[1], [0], [0], [1], [0, 0, 1, 1], [], []>} : vector<16x32xbf16>, vector<32x2xbf16>, vector<16x2xf32> -> vector<16x2xf32>
    %c0_77 = arith.constant 0 : index
    %c0_78 = arith.constant 0 : index
    %180 = vector.load %arg15[%c0_77, %c0_78] : memref<1x2xf32, #tpu.memory_space<vmem>>, vector<1x2xf32>
    %181 = vector.broadcast %180 : vector<1x2xf32> to vector<16x2xf32>
    %182 = arith.addf %179, %181 : vector<16x2xf32>
    %c0_79 = arith.constant 0 : index
    %c0_80 = arith.constant 0 : index
    %183 = vector.load %arg17[%c0_79, %c0_80] : memref<16x2xf32, #tpu.memory_space<vmem>>, vector<16x2xf32>
    tpu.vector_store %arg17[%c0_79, %c0_80], %182 {strides = array<i32>} : memref<16x2xf32, #tpu.memory_space<vmem>>, vector<16x2xf32>,
    return
  }
}

</mosaic_0001>

<bundles_post_ra>
// kernel: roberta_qa_forward.3
= control target key start
LH: loop header
LB: loop body
LE: loop exit
PB: predicated region body
PF: predicated region fallthrough
CT: control target
= control target key end

     0   :  { %vm18_vm0 = vcmask 261120   ;;  %s118_s0 = inlined_call_operand.vmem [shape: f32[16,32], index: 0, kind: input, shape index: {}]   ;;  %s119_s1 = inlined_call_operand.vmem [shape: f32[1,32], index: 1, kind: input, shape index: {}]   ;;  %s120_s2 = inlined_call_operand.vmem [shape: f32[1,32], index: 2, kind: input, shape index: {}]   ;;  %s121_s3 = inlined_call_operand.vmem [shape: f32[16,32], index: 3, kind: output, shape index: {}]  }
   0x1   :  { %v14_v0 = vld [vmem:[%s118_s0] sm:$0xff]  ;;  %v15_v1 = vld [vmem:[%s118_s0 + $0x8] sm:$0xff] }
   0x2   :  { %v19_v2 = vsel %vm18_vm0, %v14_v0, 0.0  ;;  %v22_v3 = vsel %vm18_vm0, %v15_v1, 0.0  ;;  %v68_v21 = vld [vmem:[%s119_s1] ss:$0 sm:$0xff] }
   0x3   :  { %20 = vadd.xlane.f32.xlu0 %v19_v2  ;;  %v69_v23 = vld [vmem:[%s120_s2] ss:$0 sm:$0xff] }
   0x7   :  { %23 = vadd.xlane.f32.xlu0 %v22_v3 }
  0x90   :  { %v21_v4 = vpop.xlane.xlu0 %20 }
  0x91   :  { %v26_v5 = vmul.f32 0.03125, %v21_v4 }
  0x93   :  { %v28_v6 = vsub.f32 %v14_v0, %v26_v5 }
  0x94   :  { %v24_v7 = vpop.xlane.xlu0 %23 }
  0x95   :  { %v27_v8 = vmul.f32 0.03125, %v24_v7  ;;  %v30_v9 = vmul.f32 %v28_v6, %v28_v6 }
  0x97   :  { %v29_v10 = vsub.f32 %v15_v1, %v27_v8  ;;  %v32_v11 = vsel %vm18_vm0, %v30_v9, 0.0 }
  0x98   :  { %33 = vadd.xlane.f32.xlu1 %v32_v11 }
  0x99   :  { %v31_v12 = vmul.f32 %v29_v10, %v29_v10 }
  0x9b   :  { %v35_v13 = vsel %vm18_vm0, %v31_v12, 0.0 }
  0x9c   :  { %36 = vadd.xlane.f32.xlu1 %v35_v13 }
 0x125   :  { %v34_v14 = vpop.xlane.xlu1 %33 }
 0x126   :  { %v38_v15 = vmul.f32 0.03125, %v34_v14 }
 0x128   :  { %v40_v16 = vadd.f32 1e-05, %v38_v15 }
 0x129   :  { %v37_v17 = vpop.xlane.xlu1 %36 }
 0x12a   :  { %70 = vrsqrt.f32 %v40_v16  ;;  %v39_v18 = vmul.f32 0.03125, %v37_v17 }
 0x12c   :  { %v41_v19 = vadd.f32 1e-05, %v39_v18 }
 0x12e   :  { %72 = vrsqrt.f32 %v41_v19 }
 0x134   :  { %v71_v20 = vpop.eup %70 }
 0x135   :  { %v44_v22 = vmul.f32 %v71_v20, %v28_v6 }
 0x137   :  { %v52_v24 = vmul.f32 %v68_v21, %v44_v22 }
 0x138   :  { %v73_v25 = vpop.eup %72 }
 0x139   :  { %v60_v26 = vadd.f32 %v69_v23, %v52_v24  ;;  %v45_v27 = vmul.f32 %v73_v25, %v29_v10 }
 0x13b   :  { %62 = vst.msk [vmem:[%s121_s3] sm:$0xff] %vm18_vm0, %v60_v26  ;;  %v53_v28 = vmul.f32 %v68_v21, %v45_v27 }
 0x13d   :  { %v61_v29 = vadd.f32 %v69_v23, %v53_v28 }
 0x13f   :  { %63 = vst.msk [vmem:[%s121_s3 + $0x8] sm:$0xff] %vm18_vm0, %v61_v29 }

// kernel: roberta_qa_forward.5
= control target key start
LH: loop header
LB: loop body
LE: loop exit
PB: predicated region body
PF: predicated region fallthrough
CT: control target
= control target key end

     0   :  { %s1728_s0 = inlined_call_operand.vmem [shape: f32[16,32], index: 0, kind: input, shape index: {}]   ;;  %s1729_s1 = inlined_call_operand.vmem [shape: f32[2,8], index: 1, kind: input, shape index: {}]   ;;  %s1730_s2 = inlined_call_operand.vmem [shape: f32[32,96], index: 2, kind: input, shape index: {}]   ;;  %s1731_s3 = inlined_call_operand.vmem [shape: f32[1,96], index: 3, kind: input, shape index: {}]   ;;  %s1732_s4 = inlined_call_operand.vmem [shape: f32[32,32], index: 4, kind: input, shape index: {}]   ;;  %s1733_s5 = inlined_call_operand.vmem [shape: f32[1,32], index: 5, kind: input, shape index: {}]   ;;  %s1734_s6 = inlined_call_operand.vmem [shape: f32[1,32], index: 6, kind: input, shape index: {}]   ;;  %s1735_s7 = inlined_call_operand.vmem [shape: f32[1,32], index: 7, kind: input, shape index: {}]   ;;  %s1736_s8 = inlined_call_operand.vmem [shape: f32[32,64], index: 8, kind: input, shape index: {}]   ;;  %s1737_s9 = inlined_call_operand.vmem [shape: f32[1,64], index: 9, kind: input, shape index: {}]   ;;  %s1738_s10 = inlined_call_operand.vmem [shape: f32[64,32], index: 10, kind: input, shape index: {}]   ;;  %s1739_s11 = inlined_call_operand.vmem [shape: f32[1,32], index: 11, kind: input, shape index: {}]   ;;  %s1740_s12 = inlined_call_operand.vmem [shape: f32[1,32], index: 12, kind: input, shape index: {}]   ;;  %s1741_s13 = inlined_call_operand.vmem [shape: f32[1,32], index: 13, kind: input, shape index: {}]   ;;  %s1742_s14 = inlined_call_operand.vmem [shape: f32[32,2], index: 14, kind: input, shape index: {}]   ;;  %s1743_s15 = inlined_call_operand.vmem [shape: f32[1,2], index: 15, kind: input, shape index: {}]   ;;  %s1744_s16 = inlined_call_operand.hbm [shape: f32[16,32], index: 16, kind: output, shape index: {0}]   ;;  %s1745_s17 = inlined_call_operand.vmem [shape: f32[16,2], index: 17, kind: output, shape index: {1}]  }
   0x1   :  { %1747 = sst [smem:[#allocation6_spill]] %s1728_s0 }
   0x2   :  { %1748 = sst [smem:[#allocation7_spill]] %s1729_s1 }
   0x3   :  { %v60_v0 = vld [vmem:[%s1730_s2] sm:$0xff]  ;;  %v61_v1 = vld [vmem:[%s1730_s2 + $0x8] sm:$0xff]  ;;  %v62_v2 = vld [vmem:[%s1730_s2 + $0x10] sm:$0xff]  ;;  %v1391_v3 = vmov 0.0   ;;  %vm1392_vm0 = vmmov 0  }
   0x4   :  { %1244 = vmatprep.subr.bf16.mxu0 %v1391_v3  ;;  %v64_v4 = vpack.c.bf16 %v61_v1, %v60_v0  ;;  %v63_v5 = vld [vmem:[%s1730_s2 + $0x18] sm:$0xff]  ;;  %1248 = vmatprep.mubr.msk.bf16.mxu0 %vm1392_vm0, %v1391_v3 }
   0x5   :  { %1252 = vmatprep.subr.mxu1 %v1391_v3  ;;  %1254 = vmatprep.mubr.msk.f32.mxu1 %vm1392_vm0, %v1391_v3 }
   0x6   :  { %23 = vsyncpa [#allocation4], 0  ;;  %1245 = vmatpush3.bf16.msra.mxu0 %v64_v4  ;;  %v65_v6 = vpack.c.bf16 %v63_v5, %v62_v2  ;;  %s1749_s1 = sld [smem:[#allocation6_spill]]  ;;  %vm73_vm1 = vcmask 261120   ;;  %v1185_v10 = vld [vmem:[%s1731_s3] ss:$0 sm:$0xff]  ;;  %v198_v19 = vlaneseq }
   0x7   :  { %1246 = vmatprep.subr.bf16.mxu0 %v1391_v3  ;;  %s1393_s23 = smov 64   ;;  %s1394_s24 = smov 96   ;;  %vm122_vm2 = vcmask 130048   ;;  %vm203_vm3 = vcmask 64512   ;;  %vm463_vm4 = vcmask 261248   ;;  %vm1011_vm5 = vcmask 523264  }
   0x8   :  { %s1395_s25 = smov 80   ;;  %s1396_s26 = smov 112   ;;  %v199_v20 = vshrl.u32 %v198_v19, 7 }
   0x9   :  { %s1750_s28 = sld [smem:[#allocation7_spill]]  ;;  %s1397_s29 = smov 48  }
   0xa   :  { %1247 = vmatpush3.bf16.msra.mxu0 %v65_v6  ;;  %v200_v21 = vsub.s32 0, %v199_v20  ;;  %v545_v44 = vsub.s32 1, %v199_v20  ;;  %s1398_s22 = smov 16   ;;  %s1399_s2 = smov [#allocation3]  }
   0xb   :  { %1267 = vmatprep.subr.mxu0 %v1391_v3 }
   0xc   :  { %v1513_v7 = vld [vmem:[%s1749_s1] sm:$0xff]  ;;  %v1518_v8 = vld [vmem:[%s1749_s1 + $0x8] sm:$0xff] }
   0xd   :  { %v59_v9 = vpack.c.bf16 %v1518_v8, %v1513_v7 }
   0xf   :  { %1249 = vmatmul.mubr.msk.bf16.vlgmr.msra.gmra.mrb[0].mxu0 %vm73_vm1, %v59_v9  ;;  %v118_v22 = vld [vmem:[%s1750_s28] sm:$0x3] }
  0x10   :  { %1269 = vmatprep.mubr.msk.f32.mxu0 %vm1392_vm0, %v1391_v3  ;;  %v201_v23 = vrot.slane %v118_v22, %v200_v21  ;;  %v546_v49 = vrot.slane %v118_v22, %v545_v44  ;;  %v1199_v44 = vld [vmem:[%s1733_s5] ss:$0 sm:$0xff] }
  0xe2   :  { %v111_v11 = vpop.f32.mrb[0].mxu0 }
  0xe3   :  { %v1530_v12 = vadd.f32 %v1185_v10, %v111_v11  ;;  %v1250_v13 = vpop.f32.mrb[1].mxu0 }
  0xe4   :  { %v114_v14 = vpop.f32.mrb[2].mxu0 }
  0xe5   :  { %215 = vrot.lane.b32.xlu1 %v1530_v12, %s1393_s23  ;;  %120 = vrot.lane.b32.xlu0 %v1530_v12, %s1394_s24  ;;  %v1251_v15 = vpop.f32.mrb[3].mxu0  ;;  %v1538_v16 = vadd.f32 %v1185_v10, %v114_v14 }
  0xe9   :  { %294 = vrot.lane.b32.xlu1 %v1530_v12, %s1395_s25 }
  0xed   :  { %292 = vrot.lane.b32.xlu1 %v1530_v12, %s1396_s26 }
  0xf1   :  { %466 = vrot.lane.b32.xlu1 %v1538_v16, %s1394_s24 }
 0x157   :  { %v121_v17 = vpop.permute.xlu0 %120  ;;  %v216_v18 = vpop.permute.xlu1 %215 }
 0x158   :  { %1253 = vmatpush3.xpose.msk.msra.mxu1 %vm122_vm2, %v121_v17 }
 0x159   :  { %1257 = vmatprep.subr.mxu1 %v1391_v3 }
 0x15b   :  { %1255 = vmatmul.mubr.msk.f32.vlgmr.msra.gmra.mrb[0].mxu1 %vm122_vm2, %v1530_v12  ;;  %v295_v34 = vpop.permute.xlu1 %294 }
 0x15c   :  { %1258 = vmatpush3.msra.mxu1 %v216_v18  ;;  %1259 = vmatprep.mubr.msk.f32.mxu1 %vm1392_vm0, %v1391_v3 }
 0x15d   :  { %1262 = vmatprep.subr.mxu1 %v1391_v3 }
 0x15f   :  { %v293_v35 = vpop.permute.xlu1 %292 }
 0x163   :  { %v467_v36 = vpop.permute.xlu1 %466 }
 0x22e   :  { %v193_v24 = vpop.f32.mrb[0].mxu1 }
 0x22f   :  { %v197_v25 = vmul.f32 0.25, %v193_v24  ;;  %v1256_v26 = vpop.f32.mrb[1].mxu1 }
 0x231   :  { %v202_v27 = vadd.f32 %v201_v23, %v197_v25 }
 0x233   :  { %v204_v28 = vsel %vm203_vm3, %v202_v27, -inf }
 0x234   :  { %205 = vmax.xlane.f32.xlu0 %v204_v28  ;;  %v812_v28 = vld [vmem:[%s1732_s4 + $0x8] sm:$0xff] }
 0x24a   :  { %636 = vrot.lane.b32.xlu0 %v1538_v16, %s1396_s26 }
 0x2c1   :  { %v206_v29 = vpop.xlane.xlu0 %205 }
 0x2c2   :  { %v207_v30 = vsub.f32 %v202_v27, %v206_v29  ;;  %v811_v27 = vld [vmem:[%s1732_s4] sm:$0xff]  ;;  %v813_v29 = vld [vmem:[%s1732_s4 + $0x10] sm:$0xff] }
 0x2c4   :  { %v208_v31 = vmul.f32 1.442695, %v207_v30  ;;  %v815_v30 = vpack.c.bf16 %v812_v28, %v811_v27  ;;  %v994_v28 = vld [vmem:[%s1738_s10 + $0x10] sm:$0xff] }
 0x2c5   :  { %v637_v41 = vpop.permute.xlu0 %636 }
 0x2c6   :  { %1339 = vpow2.f32 %v208_v31  ;;  %v814_v31 = vld [vmem:[%s1732_s4 + $0x18] sm:$0xff] }
 0x2d0   :  { %v1340_v32 = vpop.eup %1339 }
 0x2d1   :  { %v210_v33 = vsel %vm203_vm3, %v1340_v32, 0.0 }
 0x2d2   :  { %211 = vadd.xlane.f32.xlu1 %v210_v33 }
 0x2e3   :  { %638 = vrot.lane.b32.xlu1 %v1538_v16, %s1395_s25 }
 0x35f   :  { %v212_v37 = vpop.xlane.xlu1 %211 }
 0x360   :  { %1341 = vrcp.f32 %v212_v37 }
 0x363   :  { %v639_v40 = vpop.permute.xlu1 %638 }
 0x36a   :  { %v1342_v38 = vpop.eup %1341 }
 0x36b   :  { %v214_v39 = vmul.f32 %v1342_v38, %v1340_v32  ;;  %v816_v32 = vpack.c.bf16 %v814_v31, %v813_v29  ;;  %v995_v29 = vld [vmem:[%s1738_s10 + $0x18] sm:$0xff]  ;;  %v996_v31 = vld [vmem:[%s1738_s10 + $0x20] sm:$0xff] }
 0x36d   :  { %1260 = vmatmul.mubr.msk.f32.vlgmr.msra.gmra.mrb[2].mxu1 %vm203_vm3, %v214_v39 }
 0x36e   :  { %1263 = vmatpush3.xpose.msk.msra.mxu1 %vm122_vm2, %v295_v34  ;;  %1264 = vmatprep.mubr.msk.f32.mxu1 %vm1392_vm0, %v1391_v3 }
 0x36f   :  { %1272 = vmatprep.subr.mxu1 %v1391_v3 }
 0x371   :  { %1265 = vmatmul.mubr.msk.f32.vlgmr.msra.gmra.mrb[4].mxu1 %vm122_vm2, %v293_v35 }
 0x372   :  { %1273 = vmatpush3.xpose.msk.msra.mxu1 %vm122_vm2, %v467_v36  ;;  %1274 = vmatprep.mubr.msk.f32.mxu1 %vm1392_vm0, %v1391_v3 }
 0x373   :  { %1282 = vmatprep.subr.mxu1 %v1391_v3 }
 0x375   :  { %1275 = vmatmul.mubr.msk.f32.vlgmr.msra.gmra.mrb[6].mxu1 %vm122_vm2, %v1538_v16 }
 0x376   :  { %1283 = vmatpush3.xpose.msk.msra.mxu1 %vm122_vm2, %v639_v40  ;;  %1284 = vmatprep.mubr.msk.f32.mxu1 %vm1392_vm0, %v1391_v3 }
 0x377   :  { %1292 = vmatprep.subr.bf16.mxu1 %v1391_v3 }
 0x379   :  { %1285 = vmatmul.mubr.msk.f32.vlgmr.msra.gmra.mrb[8].mxu1 %vm122_vm2, %v637_v41 }
 0x37a   :  { %1296 = vmatprep.mubr.msk.bf16.mxu1 %vm1392_vm0, %v1391_v3  ;;  %1293 = vmatpush3.bf16.msra.mxu1 %v815_v30  ;;  %v1001_v30 = vpack.c.bf16 %v995_v29, %v994_v28 }
 0x37b   :  { %1294 = vmatprep.subr.bf16.mxu1 %v1391_v3 }
 0x37e   :  { %1295 = vmatpush3.bf16.msra.mxu1 %v816_v32  ;;  %v997_v32 = vld [vmem:[%s1738_s10 + $0x28] sm:$0xff] }
 0x37f   :  { %1308 = vmatprep.subr.bf16.mxu1 %v1391_v3 }
 0x440   :  { %v287_v42 = vpop.f32.mrb[2].mxu1 }
 0x441   :  { %291 = vst.msk [vmem:[#allocation2] sm:$0xff] %vm122_vm2, %v287_v42  ;;  %v1261_v43 = vpop.f32.mrb[3].mxu1 }
 0x444   :  { %v366_v45 = vpop.f32.mrb[4].mxu1 }
 0x445   :  { %v370_v46 = vmul.f32 0.25, %v366_v45  ;;  %v1266_v47 = vpop.f32.mrb[5].mxu1 }
 0x447   :  { %v371_v48 = vadd.f32 %v370_v46, %v201_v23 }
 0x448   :  { %v538_v50 = vpop.f32.mrb[6].mxu1 }
 0x449   :  { %v542_v51 = vmul.f32 0.25, %v538_v50  ;;  %v1276_v52 = vpop.f32.mrb[7].mxu1  ;;  %v372_v53 = vsel %vm203_vm3, %v371_v48, -inf }
 0x44a   :  { %373 = vmax.xlane.f32.xlu1 %v372_v53 }
 0x44b   :  { %v547_v54 = vadd.f32 %v546_v49, %v542_v51 }
 0x44c   :  { %v710_v55 = vpop.f32.mrb[8].mxu1 }
 0x44d   :  { %v714_v56 = vmul.f32 0.25, %v710_v55  ;;  %v1286_v57 = vpop.f32.mrb[9].mxu1  ;;  %v548_v58 = vsel %vm203_vm3, %v547_v54, -inf }
 0x44e   :  { %549 = vmax.xlane.f32.xlu0 %v548_v58 }
 0x44f   :  { %v715_v59 = vadd.f32 %v714_v56, %v546_v49 }
 0x451   :  { %v716_v60 = vsel %vm203_vm3, %v715_v59, -inf }
 0x452   :  { %717 = vmax.xlane.f32.xlu1 %v716_v60 }
 0x463   :  { %559 = vrot.lane.b32.xlu1 %v1538_v16, %s1393_s23 }
 0x464   :  { %383 = vrot.lane.b32.xlu0 %v1530_v12, %s1397_s29 }
 0x4d7   :  { %v374_v61 = vpop.xlane.xlu1 %373 }
 0x4d8   :  { %v375_v62 = vsub.f32 %v371_v48, %v374_v61 }
 0x4da   :  { %v376_v63 = vmul.f32 1.442695, %v375_v62 }
 0x4db   :  { %v550_v0 = vpop.xlane.xlu0 %549 }
 0x4dc   :  { %1343 = vpow2.f32 %v376_v63  ;;  %v551_v1 = vsub.f32 %v547_v54, %v550_v0  ;;  %v917_v0 = vld [vmem:[%s1736_s8 + $0x8] sm:$0xff] }
 0x4de   :  { %v552_v2 = vmul.f32 1.442695, %v551_v1 }
 0x4df   :  { %v384_v4 = vpop.permute.xlu0 %383  ;;  %v718_v5 = vpop.xlane.xlu1 %717 }
 0x4e0   :  { %1345 = vpow2.f32 %v552_v2  ;;  %v719_v6 = vsub.f32 %v715_v59, %v718_v5  ;;  %1268 = vmatpush3.msra.mxu0 %v384_v4  ;;  %v918_v2 = vld [vmem:[%s1736_s8 + $0x10] sm:$0xff]  ;;  %v919_v4 = vld [vmem:[%s1736_s8 + $0x18] sm:$0xff] }
 0x4e1   :  { %1277 = vmatprep.subr.mxu0 %v1391_v3  ;;  %v921_v5 = vpack.c.bf16 %v919_v4, %v918_v2 }
 0x4e2   :  { %v720_v9 = vmul.f32 1.442695, %v719_v6 }
 0x4e3   :  { %v560_v17 = vpop.permute.xlu1 %559 }
 0x4e4   :  { %1347 = vpow2.f32 %v720_v9 }
 0x4e6   :  { %v1344_v10 = vpop.eup %1343 }
 0x4e7   :  { %v378_v11 = vsel %vm203_vm3, %v1344_v10, 0.0 }
 0x4e8   :  { %379 = vadd.xlane.f32.xlu1 %v378_v11 }
 0x4ea   :  { %v1346_v12 = vpop.eup %1345 }
 0x4eb   :  { %v554_v13 = vsel %vm203_vm3, %v1346_v12, 0.0 }
 0x4ec   :  { %555 = vadd.xlane.f32.xlu1 %v554_v13 }
 0x4ee   :  { %v1348_v14 = vpop.eup %1347 }
 0x4ef   :  { %v722_v15 = vsel %vm203_vm3, %v1348_v14, 0.0 }
 0x4f0   :  { %723 = vadd.xlane.f32.xlu1 %v722_v15 }
 0x501   :  { %727 = vrot.lane.b32.xlu1 %v1538_v16, %s1397_s29 }
 0x575   :  { %v380_v18 = vpop.xlane.xlu1 %379 }
 0x576   :  { %1349 = vrcp.f32 %v380_v18 }
 0x579   :  { %v556_v19 = vpop.xlane.xlu1 %555 }
 0x57a   :  { %1351 = vrcp.f32 %v556_v19 }
 0x57d   :  { %v724_v20 = vpop.xlane.xlu1 %723 }
 0x57e   :  { %1353 = vrcp.f32 %v724_v20 }
 0x580   :  { %v1350_v21 = vpop.eup %1349 }
 0x581   :  { %v382_v22 = vmul.f32 %v1350_v21, %v1344_v10  ;;  %v728_v16 = vpop.permute.xlu1 %727  ;;  %v1202_v21 = vld [vmem:[%s1735_s7] ss:$0 sm:$0xff] }
 0x583   :  { %1270 = vmatmul.mubr.msk.f32.vlgmr.msra.gmra.mrb[4].mxu0 %vm203_vm3, %v382_v22 }
 0x584   :  { %v1352_v23 = vpop.eup %1351  ;;  %1278 = vmatpush3.msra.mxu0 %v560_v17  ;;  %1279 = vmatprep.mubr.msk.f32.mxu0 %vm1392_vm0, %v1391_v3  ;;  %v1201_v17 = vld [vmem:[%s1734_s6] ss:$0 sm:$0xff] }
 0x585   :  { %v558_v24 = vmul.f32 %v1352_v23, %v1346_v12  ;;  %1287 = vmatprep.subr.mxu0 %v1391_v3 }
 0x587   :  { %1280 = vmatmul.mubr.msk.f32.vlgmr.msra.gmra.mrb[6].mxu0 %vm203_vm3, %v558_v24 }
 0x588   :  { %v1354_v25 = vpop.eup %1353  ;;  %1288 = vmatpush3.msra.mxu0 %v728_v16  ;;  %1289 = vmatprep.mubr.msk.f32.mxu0 %vm1392_vm0, %v1391_v3 }
 0x589   :  { %v726_v26 = vmul.f32 %v1354_v25, %v1348_v14  ;;  %1300 = vmatprep.subr.bf16.mxu0 %v1391_v3  ;;  %v992_v25 = vld [vmem:[%s1738_s10] sm:$0xff] }
 0x58b   :  { %1290 = vmatmul.mubr.msk.f32.vlgmr.msra.gmra.mrb[8].mxu0 %vm203_vm3, %v726_v26  ;;  %v993_v26 = vld [vmem:[%s1738_s10 + $0x8] sm:$0xff] }
 0x58c   :  { %1304 = vmatprep.mubr.msk.bf16.mxu0 %vm1392_vm0, %v1391_v3  ;;  %v1000_v27 = vpack.c.bf16 %v993_v26, %v992_v25  ;;  %v1108_v25 = vld [vmem:[%s1742_s14 + $0x18] sm:$0xff] }
 0x656   :  { %v455_v33 = vpop.f32.mrb[4].mxu0 }
 0x657   :  { %460 = vrot.lane.b32.xlu0 %v455_v33, %s1398_s22  ;;  %v1271_v34 = vpop.f32.mrb[5].mxu0  ;;  %v1002_v33 = vpack.c.bf16 %v997_v32, %v996_v31 }
 0x658   :  { %v998_v34 = vld [vmem:[%s1738_s10 + $0x30] sm:$0xff] }
 0x65a   :  { %v631_v35 = vpop.f32.mrb[6].mxu0 }
 0x65b   :  { %635 = vst.msk [vmem:[#allocation2 + $0x8] sm:$0xff] %vm122_vm2, %v631_v35  ;;  %v1281_v36 = vpop.f32.mrb[7].mxu0  ;;  %v999_v35 = vld [vmem:[%s1738_s10 + $0x38] sm:$0xff] }
 0x65c   :  { %v1003_v36 = vpack.c.bf16 %v999_v35, %v998_v34  ;;  %v1207_v34 = vld [vmem:[%s1740_s12] ss:$0 sm:$0xff]  ;;  %s1170_s12 = sshll.u32 %s1399_s2, 4  ;;  %s1171_s12 = int_to_ptr.vmem [resolvable:$true] %s1170_s12 }
 0x65d   :  { %p1372_p1 = scmp.lt.s32.totalorder %s1171_s12, %s1171_s12 }
 0x65e   :  { %v799_v37 = vpop.f32.mrb[8].mxu0 }
 0x65f   :  { %804 = vrot.lane.b32.xlu1 %v799_v37, %s1398_s22  ;;  %v1291_v38 = vpop.f32.mrb[9].mxu0  ;;  %v1203_v37 = vld [vmem:[%s1737_s9] ss:$0 sm:$0xff]  ;;  %s1367_s22 = scalar_lea.vmem %s1171_s12, 256 }
 0x660   :  { %p1368_p0 = scmp.ne.s32.totalorder %s1171_s12, %s1367_s22  ;;  %p1373_p2 = scmp.lt.s32.totalorder %s1367_s22, %s1367_s22 }
 0x662   :  { %p1374_p3 = por %p1373_p2, %p1372_p1 }
 0x664   :  { %p1375_p4 = pnand %p1374_p3, %p1368_p0 }
 0x6c9   :  { %v461_v39 = vpop.permute.xlu0 %460 }
 0x6ca   :  { %464 = vst.msk [vmem:[#allocation2] sm:$0xff] %vm463_vm4, %v461_v39 }
 0x6d1   :  { %v805_v40 = vpop.permute.xlu1 %804  ;;  %v808_v41 = vld [vmem:[#allocation2] sm:$0xff] }
 0x6d2   :  { %807 = vst.msk [vmem:[#allocation2 + $0x8] sm:$0xff] %vm463_vm4, %v805_v40 }
 0x6d9   :  { %v809_v42 = vld [vmem:[#allocation2 + $0x8] sm:$0xff] }
 0x6da   :  { %v810_v43 = vpack.c.bf16 %v809_v42, %v808_v41 }
 0x6dc   :  { %1297 = vmatmul.mubr.msk.bf16.vlgmr.msra.gmra.mrb[12].mxu1 %vm73_vm1, %v810_v43 }
 0x6dd   :  { %1316 = vmatprep.mubr.msk.bf16.mxu1 %vm1392_vm0, %v1391_v3  ;;  %1309 = vmatpush3.bf16.msra.mxu1 %v1000_v27 }
 0x6de   :  { %1310 = vmatprep.subr.bf16.mxu1 %v1391_v3 }
 0x6e1   :  { %1311 = vmatpush3.bf16.msra.mxu1 %v1001_v30 }
 0x6e2   :  { %1312 = vmatprep.subr.bf16.mxu1 %v1391_v3 }
 0x6e5   :  { %1313 = vmatpush3.bf16.msra.mxu1 %v1002_v33 }
 0x6e6   :  { %1314 = vmatprep.subr.bf16.mxu1 %v1391_v3 }
 0x6e9   :  { %1315 = vmatpush3.bf16.msra.mxu1 %v1003_v36 }
 0x7af   :  { %v861_v45 = vpop.f32.mrb[12].mxu1 }
 0x7b0   :  { %v862_v46 = vadd.f32 %v1199_v44, %v861_v45  ;;  %v1298_v47 = vpop.f32.mrb[13].mxu1 }
 0x7b1   :  { %v864_v48 = vpop.f32.mrb[14].mxu1 }
 0x7b2   :  { %v865_v49 = vadd.f32 %v1199_v44, %v864_v48  ;;  %v1299_v50 = vpop.f32.mrb[15].mxu1  ;;  %v868_v51 = vadd.f32 %v862_v46, %v1513_v7 }
 0x7b4   :  { %v872_v52 = vsel %vm73_vm1, %v868_v51, 0.0  ;;  %v869_v53 = vadd.f32 %v865_v49, %v1518_v8  ;;  %v916_v8 = vld [vmem:[%s1736_s8] sm:$0xff] }
 0x7b5   :  { %873 = vadd.xlane.f32.xlu0 %v872_v52  ;;  %v920_v1 = vpack.c.bf16 %v917_v0, %v916_v8 }
 0x7b6   :  { %v875_v54 = vsel %vm73_vm1, %v869_v53, 0.0 }
 0x7b7   :  { %876 = vadd.xlane.f32.xlu1 %v875_v54  ;;  %1301 = vmatpush3.bf16.msra.mxu0 %v920_v1 }
 0x7b8   :  { %1302 = vmatprep.subr.bf16.mxu0 %v1391_v3 }
 0x7bb   :  { %1303 = vmatpush3.bf16.msra.mxu0 %v921_v5 }
 0x7bc   :  { %1320 = vmatprep.subr.bf16.mxu0 %v1391_v3 }
 0x842   :  { %v874_v55 = vpop.xlane.xlu0 %873 }
 0x843   :  { %v879_v56 = vmul.f32 0.03125, %v874_v55 }
 0x844   :  { %v877_v57 = vpop.xlane.xlu1 %876 }
 0x845   :  { %v881_v58 = vsub.f32 %v868_v51, %v879_v56  ;;  %v880_v59 = vmul.f32 0.03125, %v877_v57 }
 0x847   :  { %v882_v60 = vsub.f32 %v869_v53, %v880_v59  ;;  %v883_v61 = vmul.f32 %v881_v58, %v881_v58 }
 0x849   :  { %v885_v62 = vsel %vm73_vm1, %v883_v61, 0.0  ;;  %v884_v63 = vmul.f32 %v882_v60, %v882_v60 }
 0x84a   :  { %886 = vadd.xlane.f32.xlu0 %v885_v62 }
 0x84b   :  { %v888_v7 = vsel %vm73_vm1, %v884_v63, 0.0  ;;  %v1205_v63 = vld [vmem:[%s1739_s11] ss:$0 sm:$0xff] }
 0x84e   :  { %889 = vadd.xlane.f32.xlu0 %v888_v7 }
 0x8d7   :  { %v887_v6 = vpop.xlane.xlu0 %886 }
 0x8d8   :  { %v891_v9 = vmul.f32 0.03125, %v887_v6 }
 0x8da   :  { %v893_v10 = vadd.f32 1e-05, %v891_v9 }
 0x8db   :  { %v890_v11 = vpop.xlane.xlu0 %889 }
 0x8dc   :  { %1355 = vrsqrt.f32 %v893_v10  ;;  %v892_v12 = vmul.f32 0.03125, %v890_v11 }
 0x8de   :  { %v894_v13 = vadd.f32 1e-05, %v892_v12 }
 0x8e0   :  { %1357 = vrsqrt.f32 %v894_v13 }
 0x8e6   :  { %v1356_v14 = vpop.eup %1355 }
 0x8e7   :  { %v897_v15 = vmul.f32 %v1356_v14, %v881_v58 }
 0x8e9   :  { %v905_v19 = vmul.f32 %v1201_v17, %v897_v15 }
 0x8ea   :  { %v1358_v18 = vpop.eup %1357 }
 0x8eb   :  { %v898_v20 = vmul.f32 %v1358_v18, %v882_v60  ;;  %v913_v23 = vadd.f32 %v1202_v21, %v905_v19 }
 0x8ed   :  { %v906_v22 = vmul.f32 %v1201_v17, %v898_v20 }
 0x8ef   :  { %v914_v24 = vadd.f32 %v1202_v21, %v906_v22  ;;  %v1105_v22 = vld [vmem:[%s1742_s14] sm:$0xff] }
 0x8f1   :  { %v915_v16 = vpack.c.bf16 %v914_v24, %v913_v23 }
 0x8f3   :  { %1305 = vmatmul.mubr.msk.bf16.vlgmr.msra.gmra.mrb[12].mxu0 %vm73_vm1, %v915_v16  ;;  %v1107_v16 = vld [vmem:[%s1742_s14 + $0x10] sm:$0xff] }
 0x8f4   :  { %1324 = vmatprep.mubr.msk.bf16.mxu0 %vm1392_vm0, %v1391_v3  ;;  %v1110_v26 = vpack.c.bf16 %v1108_v25, %v1107_v16 }
 0x9c6   :  { %v966_v38 = vpop.f32.mrb[12].mxu0 }
 0x9c7   :  { %v967_v39 = vadd.f32 %v1203_v37, %v966_v38  ;;  %v1306_v40 = vpop.f32.mrb[13].mxu0 }
 0x9c8   :  { %v969_v41 = vpop.f32.mrb[14].mxu0 }
 0x9c9   :  { %v973_v42 = vmul.f32 %v967_v39, %v967_v39  ;;  %v970_v43 = vadd.f32 %v1203_v37, %v969_v41  ;;  %v1307_v44 = vpop.f32.mrb[15].mxu0 }
 0x9cb   :  { %v975_v45 = vmul.f32 %v973_v42, %v967_v39  ;;  %v974_v46 = vmul.f32 %v970_v43, %v970_v43 }
 0x9cd   :  { %v977_v47 = vmul.f32 0.044715, %v975_v45  ;;  %v976_v48 = vmul.f32 %v974_v46, %v970_v43 }
 0x9cf   :  { %v979_v49 = vadd.f32 %v977_v47, %v967_v39  ;;  %v978_v50 = vmul.f32 0.044715, %v976_v48 }
 0x9d1   :  { %v981_v51 = vmul.f32 0.7978846, %v979_v49  ;;  %v980_v52 = vadd.f32 %v978_v50, %v970_v43 }
 0x9d3   :  { %1359 = vtanh.f32 %v981_v51  ;;  %v982_v53 = vmul.f32 0.7978846, %v980_v52 }
 0x9d5   :  { %1361 = vtanh.f32 %v982_v53 }
 0x9dd   :  { %v1360_v54 = vpop.eup %1359 }
 0x9de   :  { %v985_v55 = vadd.f32 1.0, %v1360_v54 }
 0x9df   :  { %v1362_v56 = vpop.eup %1361 }
 0x9e0   :  { %v987_v57 = vmul.f32 0.5, %v985_v55  ;;  %v986_v58 = vadd.f32 1.0, %v1362_v56 }
 0x9e2   :  { %v988_v59 = vmul.f32 0.5, %v986_v58  ;;  %v989_v60 = vmul.f32 %v987_v57, %v967_v39 }
 0x9e4   :  { %v990_v61 = vmul.f32 %v988_v59, %v970_v43 }
 0x9e6   :  { %v991_v62 = vpack.c.bf16 %v990_v61, %v989_v60 }
 0x9e8   :  { %1317 = vmatmul.mubr.msk.bf16.vlgmr.msra.gmra.mrb[16].mxu1 %vm1011_vm5, %v991_v62 }
 0xabb   :  { %v1049_v7 = vpop.f32.mrb[16].mxu1 }
 0xabc   :  { %v1050_v8 = vadd.f32 %v1205_v63, %v1049_v7  ;;  %v1318_v0 = vpop.f32.mrb[17].mxu1 }
 0xabd   :  { %v1052_v1 = vpop.f32.mrb[18].mxu1 }
 0xabe   :  { %v1053_v2 = vadd.f32 %v1205_v63, %v1052_v1  ;;  %v1319_v4 = vpop.f32.mrb[19].mxu1  ;;  %v1056_v5 = vadd.f32 %v1050_v8, %v913_v23  ;;  %v1106_v23 = vld [vmem:[%s1742_s14 + $0x8] sm:$0xff] }
 0xac0   :  { %v1060_v6 = vsel %vm73_vm1, %v1056_v5, 0.0  ;;  %v1057_v9 = vadd.f32 %v1053_v2, %v914_v24  ;;  %v1109_v24 = vpack.c.bf16 %v1106_v23, %v1105_v22 }
 0xac1   :  { %1061 = vadd.xlane.f32.xlu1 %v1060_v6 }
 0xac2   :  { %v1063_v10 = vsel %vm73_vm1, %v1057_v9, 0.0  ;;  %1321 = vmatpush3.bf16.msra.mxu0 %v1109_v24 }
 0xac3   :  { %1064 = vadd.xlane.f32.xlu0 %v1063_v10  ;;  %1322 = vmatprep.subr.bf16.mxu0 %v1391_v3  ;;  %v1208_v3 = vld [vmem:[%s1741_s13] ss:$0 sm:$0xff] }
 0xac6   :  { %1323 = vmatpush3.bf16.msra.mxu0 %v1110_v26 }
 0xb4e   :  { %v1062_v11 = vpop.xlane.xlu1 %1061 }
 0xb4f   :  { %v1066_v12 = vmul.f32 0.03125, %v1062_v11 }
 0xb50   :  { %v1065_v13 = vpop.xlane.xlu0 %1064 }
 0xb51   :  { %v1068_v14 = vsub.f32 %v1056_v5, %v1066_v12  ;;  %v1067_v15 = vmul.f32 0.03125, %v1065_v13 }
 0xb53   :  { %v1069_v17 = vsub.f32 %v1057_v9, %v1067_v15  ;;  %v1070_v18 = vmul.f32 %v1068_v14, %v1068_v14 }
 0xb55   :  { %v1072_v19 = vsel %vm73_vm1, %v1070_v18, 0.0  ;;  %v1071_v20 = vmul.f32 %v1069_v17, %v1069_v17 }
 0xb56   :  { %1073 = vadd.xlane.f32.xlu1 %v1072_v19 }
 0xb57   :  { %v1075_v21 = vsel %vm73_vm1, %v1071_v20, 0.0 }
 0xb58   :  { %1076 = vadd.xlane.f32.xlu0 %v1075_v21 }
 0xbe3   :  { %v1074_v27 = vpop.xlane.xlu1 %1073 }
 0xbe4   :  { %v1078_v28 = vmul.f32 0.03125, %v1074_v27 }
 0xbe5   :  { %v1077_v29 = vpop.xlane.xlu0 %1076 }
 0xbe6   :  { %v1080_v30 = vadd.f32 1e-05, %v1078_v28  ;;  %v1079_v31 = vmul.f32 0.03125, %v1077_v29 }
 0xbe8   :  { %1363 = vrsqrt.f32 %v1080_v30  ;;  %v1081_v32 = vadd.f32 1e-05, %v1079_v31 }
 0xbea   :  { %1365 = vrsqrt.f32 %v1081_v32 }
 0xbf2   :  { %v1364_v33 = vpop.eup %1363 }
 0xbf3   :  { %v1084_v35 = vmul.f32 %v1364_v33, %v1068_v14 }
 0xbf4   :  { %v1366_v36 = vpop.eup %1365 }
 0xbf5   :  { %v1092_v37 = vmul.f32 %v1207_v34, %v1084_v35  ;;  %v1085_v38 = vmul.f32 %v1366_v36, %v1069_v17 }
 0xbf7   :  { %v1093_v39 = vmul.f32 %v1207_v34, %v1085_v38  ;;  %v1100_v40 = vadd.f32 %v1208_v3, %v1092_v37 }
 0xbf9   :  { %v1101_v41 = vadd.f32 %v1208_v3, %v1093_v39  ;;  %1102 = vst.msk [vmem:[#allocation3] sm:$0xff] %vm73_vm1, %v1100_v40 }
 0xbfb   :  { %v1104_v42 = vpack.c.bf16 %v1101_v41, %v1100_v40  ;;  %1103 = vst.msk [vmem:[#allocation3 + $0x8] sm:$0xff] %vm73_vm1, %v1101_v41 }
 0xbfd   :  { %1325 = vmatmul.mubr.msk.bf16.vlgmr.msra.gmra.mrb[16].mxu0 %vm73_vm1, %v1104_v42 }
 0xbfe   :  { %1378 = shalt.err (!%p1375_p4)
}
 0xbff   :  { %s1379_s23 = scalar_lea.hbm %s1744_s16, 256 }
 0xc00   :  { %p1380_p5 = scmp.ne.s32.totalorder %s1744_s16, %s1379_s23  ;;  %p1383_p6 = scmp.lt.u32.totalorder %s1379_s23, %s1744_s16 }
 0xc02   :  { %p1385_p7 = pnand %p1383_p6, %p1380_p5 }
 0xc04   :  { %1388 = shalt.err (!%p1385_p7)
}
 0xc05   :  { %s1400_s3 = smov 128   ;;  %s1401_s27 = smov 8   ;;  %v1209_v43 = vld [vmem:[%s1743_s15] ss:$0 sm:$0xff]  ;;  %vm1162_vm6 = vcmask 15360  }
 0xc06   :  { %1176 = dma.vmem_to_hbm [thread:$0]  %s1171_s12, 256, %s1744_s16, [#allocation4], %s1400_s3, %s1400_s3, %s1401_s27  }
 0xcd0   :  { %v1155_v44 = vpop.f32.mrb[16].mxu0 }
 0xcd1   :  { %v1156_v45 = vadd.f32 %v1209_v43, %v1155_v44  ;;  %v1326_v46 = vpop.f32.mrb[17].mxu0 }
 0xcd2   :  { %v1158_v47 = vpop.f32.mrb[18].mxu0 }
 0xcd3   :  { %1163 = vst.msk [vmem:[%s1745_s17] sm:$0xff] %vm1162_vm6, %v1156_v45  ;;  %v1159_v48 = vadd.f32 %v1209_v43, %v1158_v47  ;;  %v1327_v49 = vpop.f32.mrb[19].mxu0 }
 0xcd5   :  { %1164 = vst.msk [vmem:[%s1745_s17 + $0x8] sm:$0xff] %vm1162_vm6, %v1159_v48 }
 0xcd6   :  { %1389 = dma.done.wait [#allocation4], 256  }
 0xcd7   :  { %1390 = vsyncadd [#allocation4], 4294967040 }
 0xcd8   :  { %1184 = vsyncpa [#allocation4], 1 }

// kernel: roberta_qa_forward.4
= control target key start
LH: loop header
LB: loop body
LE: loop exit
PB: predicated region body
PF: predicated region fallthrough
CT: control target
= control target key end

     0   :  { %v1265_v0 = vmov 0.0   ;;  %vm1266_vm0 = vmmov 0   ;;  %vm64_vm1 = vcmask 261120   ;;  %s1268_s26 = smov 96   ;;  %s1269_s27 = smov 80   ;;  %vm113_vm2 = vcmask 130048   ;;  %s1560_s2 = inlined_call_operand.vmem [shape: f32[32,96], index: 2, kind: input, shape index: {}]   ;;  %s1561_s0 = inlined_call_operand.vmem [shape: f32[16,32], index: 0, kind: input, shape index: {}]   ;;  %s1562_s3 = inlined_call_operand.vmem [shape: f32[1,96], index: 3, kind: input, shape index: {}]   ;;  %s1563_s1 = inlined_call_operand.vmem [shape: f32[2,8], index: 1, kind: input, shape index: {}]   ;;  %s1564_s4 = inlined_call_operand.vmem [shape: f32[32,32], index: 4, kind: input, shape index: {}]   ;;  %s1565_s5 = inlined_call_operand.vmem [shape: f32[1,32], index: 5, kind: input, shape index: {}]   ;;  %s1566_s8 = inlined_call_operand.vmem [shape: f32[32,64], index: 8, kind: input, shape index: {}]   ;;  %s1567_s6 = inlined_call_operand.vmem [shape: f32[1,32], index: 6, kind: input, shape index: {}]   ;;  %s1568_s7 = inlined_call_operand.vmem [shape: f32[1,32], index: 7, kind: input, shape index: {}]   ;;  %s1569_s10 = inlined_call_operand.vmem [shape: f32[64,32], index: 10, kind: input, shape index: {}]   ;;  %s1570_s9 = inlined_call_operand.vmem [shape: f32[1,64], index: 9, kind: input, shape index: {}]   ;;  %s1571_s11 = inlined_call_operand.vmem [shape: f32[1,32], index: 11, kind: input, shape index: {}]   ;;  %s1572_s12 = inlined_call_operand.vmem [shape: f32[1,32], index: 12, kind: input, shape index: {}]   ;;  %s1573_s13 = inlined_call_operand.vmem [shape: f32[1,32], index: 13, kind: input, shape index: {}]   ;;  %s1574_s14 = inlined_call_operand.vmem [shape: f32[16,32], index: 14, kind: output, shape index: {}]  }
   0x1   :  { %1153 = vmatprep.subr.bf16.mxu0 %v1265_v0  ;;  %v51_v1 = vld [vmem:[%s1560_s2] sm:$0xff]  ;;  %v52_v2 = vld [vmem:[%s1560_s2 + $0x8] sm:$0xff]  ;;  %v53_v3 = vld [vmem:[%s1560_s2 + $0x10] sm:$0xff]  ;;  %1157 = vmatprep.mubr.msk.bf16.mxu0 %vm1266_vm0, %v1265_v0  ;;  %s1270_s28 = smov 112   ;;  %v189_v19 = vlaneseq  ;;  %vm194_vm3 = vcmask 64512   ;;  %s1272_s22 = smov 16  }
   0x2   :  { %v55_v4 = vpack.c.bf16 %v52_v2, %v51_v1  ;;  %v54_v5 = vld [vmem:[%s1560_s2 + $0x18] sm:$0xff]  ;;  %1166 = vmatprep.subr.mxu1 %v1265_v0  ;;  %1168 = vmatprep.mubr.msk.f32.mxu1 %vm1266_vm0, %v1265_v0  ;;  %v1369_v7 = vld [vmem:[%s1561_s0] sm:$0xff]  ;;  %v1374_v8 = vld [vmem:[%s1561_s0 + $0x8] sm:$0xff]  ;;  %s1267_s0 = smov 64   ;;  %vm454_vm4 = vcmask 261248   ;;  %vm1002_vm5 = vcmask 523264  }
   0x3   :  { %v56_v6 = vpack.c.bf16 %v54_v5, %v53_v3  ;;  %v50_v9 = vpack.c.bf16 %v1374_v8, %v1369_v7  ;;  %v1099_v10 = vld [vmem:[%s1562_s3] ss:$0 sm:$0xff]  ;;  %v190_v20 = vshrl.u32 %v189_v19, 7 }
   0x4   :  { %1154 = vmatpush3.bf16.msra.mxu0 %v55_v4  ;;  %v109_v22 = vld [vmem:[%s1563_s1] sm:$0x3]  ;;  %s1271_s1 = smov 48  }
   0x5   :  { %1155 = vmatprep.subr.bf16.mxu0 %v1265_v0  ;;  %v191_v21 = vsub.s32 0, %v190_v20  ;;  %v536_v44 = vsub.s32 1, %v190_v20 }
   0x7   :  { %v192_v23 = vrot.slane %v109_v22, %v191_v21  ;;  %v537_v49 = vrot.slane %v109_v22, %v536_v44  ;;  %v1113_v44 = vld [vmem:[%s1565_s5] ss:$0 sm:$0xff] }
   0x8   :  { %1156 = vmatpush3.bf16.msra.mxu0 %v56_v6 }
   0x9   :  { %1161 = vmatprep.subr.mxu0 %v1265_v0 }
   0xb   :  { %1158 = vmatmul.mubr.msk.bf16.vlgmr.msra.gmra.mrb[0].mxu0 %vm64_vm1, %v50_v9 }
   0xc   :  { %1163 = vmatprep.mubr.msk.f32.mxu0 %vm1266_vm0, %v1265_v0 }
  0xde   :  { %v102_v11 = vpop.f32.mrb[0].mxu0 }
  0xdf   :  { %v1386_v12 = vadd.f32 %v1099_v10, %v102_v11  ;;  %v1159_v13 = vpop.f32.mrb[1].mxu0 }
  0xe0   :  { %v105_v14 = vpop.f32.mrb[2].mxu0 }
  0xe1   :  { %206 = vrot.lane.b32.xlu1 %v1386_v12, %s1267_s0  ;;  %111 = vrot.lane.b32.xlu0 %v1386_v12, %s1268_s26  ;;  %v1160_v15 = vpop.f32.mrb[3].mxu0  ;;  %v1394_v16 = vadd.f32 %v1099_v10, %v105_v14 }
  0xe5   :  { %285 = vrot.lane.b32.xlu1 %v1386_v12, %s1269_s27 }
  0xe9   :  { %283 = vrot.lane.b32.xlu1 %v1386_v12, %s1270_s28 }
  0xed   :  { %457 = vrot.lane.b32.xlu1 %v1394_v16, %s1268_s26 }
 0x153   :  { %v207_v17 = vpop.permute.xlu1 %206  ;;  %v112_v18 = vpop.permute.xlu0 %111 }
 0x154   :  { %1162 = vmatpush3.xpose.msk.msra.mxu0 %vm113_vm2, %v112_v18  ;;  %1167 = vmatpush3.msra.mxu1 %v207_v17 }
 0x155   :  { %1171 = vmatprep.subr.mxu1 %v1265_v0  ;;  %1176 = vmatprep.subr.mxu0 %v1265_v0 }
 0x157   :  { %1164 = vmatmul.mubr.msk.f32.vlgmr.msra.gmra.mrb[4].mxu0 %vm113_vm2, %v1386_v12  ;;  %v286_v34 = vpop.permute.xlu1 %285 }
 0x158   :  { %1178 = vmatprep.mubr.msk.f32.mxu0 %vm1266_vm0, %v1265_v0 }
 0x15b   :  { %v284_v35 = vpop.permute.xlu1 %283 }
 0x15f   :  { %v458_v36 = vpop.permute.xlu1 %457 }
 0x22a   :  { %v184_v24 = vpop.f32.mrb[4].mxu0 }
 0x22b   :  { %v188_v25 = vmul.f32 0.25, %v184_v24  ;;  %v1165_v26 = vpop.f32.mrb[5].mxu0 }
 0x22d   :  { %v193_v27 = vadd.f32 %v192_v23, %v188_v25 }
 0x22f   :  { %v195_v28 = vsel %vm194_vm3, %v193_v27, -inf }
 0x230   :  { %196 = vmax.xlane.f32.xlu0 %v195_v28  ;;  %v803_v28 = vld [vmem:[%s1564_s4 + $0x8] sm:$0xff] }
 0x246   :  { %627 = vrot.lane.b32.xlu0 %v1394_v16, %s1270_s28 }
 0x2bd   :  { %v197_v29 = vpop.xlane.xlu0 %196 }
 0x2be   :  { %v198_v30 = vsub.f32 %v193_v27, %v197_v29  ;;  %v802_v27 = vld [vmem:[%s1564_s4] sm:$0xff]  ;;  %v804_v29 = vld [vmem:[%s1564_s4 + $0x10] sm:$0xff] }
 0x2c0   :  { %v199_v31 = vmul.f32 1.442695, %v198_v30  ;;  %v806_v30 = vpack.c.bf16 %v803_v28, %v802_v27  ;;  %v985_v28 = vld [vmem:[%s1569_s10 + $0x10] sm:$0xff] }
 0x2c1   :  { %v628_v41 = vpop.permute.xlu0 %627 }
 0x2c2   :  { %1237 = vpow2.f32 %v199_v31  ;;  %v805_v31 = vld [vmem:[%s1564_s4 + $0x18] sm:$0xff] }
 0x2cc   :  { %v1238_v32 = vpop.eup %1237 }
 0x2cd   :  { %v201_v33 = vsel %vm194_vm3, %v1238_v32, 0.0 }
 0x2ce   :  { %202 = vadd.xlane.f32.xlu1 %v201_v33  ;;  %v807_v33 = vpack.c.bf16 %v805_v31, %v804_v29  ;;  %v986_v29 = vld [vmem:[%s1569_s10 + $0x18] sm:$0xff]  ;;  %v987_v31 = vld [vmem:[%s1569_s10 + $0x20] sm:$0xff] }
 0x2df   :  { %629 = vrot.lane.b32.xlu1 %v1394_v16, %s1269_s27 }
 0x35b   :  { %v203_v37 = vpop.xlane.xlu1 %202 }
 0x35c   :  { %1239 = vrcp.f32 %v203_v37 }
 0x35f   :  { %v630_v40 = vpop.permute.xlu1 %629 }
 0x366   :  { %v1240_v38 = vpop.eup %1239 }
 0x367   :  { %v205_v39 = vmul.f32 %v1240_v38, %v1238_v32 }
 0x369   :  { %1169 = vmatmul.mubr.msk.f32.vlgmr.msra.gmra.mrb[0].mxu1 %vm194_vm3, %v205_v39 }
 0x36a   :  { %1172 = vmatpush3.xpose.msk.msra.mxu1 %vm113_vm2, %v286_v34  ;;  %1173 = vmatprep.mubr.msk.f32.mxu1 %vm1266_vm0, %v1265_v0 }
 0x36b   :  { %1181 = vmatprep.subr.mxu1 %v1265_v0 }
 0x36d   :  { %1174 = vmatmul.mubr.msk.f32.vlgmr.msra.gmra.mrb[2].mxu1 %vm113_vm2, %v284_v35 }
 0x36e   :  { %1182 = vmatpush3.xpose.msk.msra.mxu1 %vm113_vm2, %v458_v36  ;;  %1183 = vmatprep.mubr.msk.f32.mxu1 %vm1266_vm0, %v1265_v0 }
 0x36f   :  { %1191 = vmatprep.subr.mxu1 %v1265_v0 }
 0x371   :  { %1184 = vmatmul.mubr.msk.f32.vlgmr.msra.gmra.mrb[4].mxu1 %vm113_vm2, %v1394_v16 }
 0x372   :  { %1192 = vmatpush3.xpose.msk.msra.mxu1 %vm113_vm2, %v630_v40  ;;  %1193 = vmatprep.mubr.msk.f32.mxu1 %vm1266_vm0, %v1265_v0 }
 0x373   :  { %1201 = vmatprep.subr.bf16.mxu1 %v1265_v0 }
 0x375   :  { %1194 = vmatmul.mubr.msk.f32.vlgmr.msra.gmra.mrb[6].mxu1 %vm113_vm2, %v628_v41 }
 0x376   :  { %1205 = vmatprep.mubr.msk.bf16.mxu1 %vm1266_vm0, %v1265_v0  ;;  %1202 = vmatpush3.bf16.msra.mxu1 %v806_v30  ;;  %v992_v30 = vpack.c.bf16 %v986_v29, %v985_v28 }
 0x377   :  { %1203 = vmatprep.subr.bf16.mxu1 %v1265_v0 }
 0x37a   :  { %1204 = vmatpush3.bf16.msra.mxu1 %v807_v33 }
 0x37b   :  { %1217 = vmatprep.subr.bf16.mxu1 %v1265_v0 }
 0x43c   :  { %v278_v42 = vpop.f32.mrb[0].mxu1 }
 0x43d   :  { %282 = vst.msk [vmem:[#allocation2] sm:$0xff] %vm113_vm2, %v278_v42  ;;  %v1170_v43 = vpop.f32.mrb[1].mxu1 }
 0x440   :  { %v357_v45 = vpop.f32.mrb[2].mxu1 }
 0x441   :  { %v361_v46 = vmul.f32 0.25, %v357_v45  ;;  %v1175_v47 = vpop.f32.mrb[3].mxu1 }
 0x443   :  { %v362_v48 = vadd.f32 %v361_v46, %v192_v23 }
 0x444   :  { %v529_v50 = vpop.f32.mrb[4].mxu1 }
 0x445   :  { %v533_v51 = vmul.f32 0.25, %v529_v50  ;;  %v1185_v52 = vpop.f32.mrb[5].mxu1  ;;  %v363_v53 = vsel %vm194_vm3, %v362_v48, -inf }
 0x446   :  { %364 = vmax.xlane.f32.xlu1 %v363_v53 }
 0x447   :  { %v538_v54 = vadd.f32 %v537_v49, %v533_v51 }
 0x448   :  { %v701_v55 = vpop.f32.mrb[6].mxu1 }
 0x449   :  { %v705_v56 = vmul.f32 0.25, %v701_v55  ;;  %v1195_v57 = vpop.f32.mrb[7].mxu1  ;;  %v539_v58 = vsel %vm194_vm3, %v538_v54, -inf }
 0x44a   :  { %540 = vmax.xlane.f32.xlu0 %v539_v58 }
 0x44b   :  { %v706_v59 = vadd.f32 %v705_v56, %v537_v49 }
 0x44d   :  { %v707_v60 = vsel %vm194_vm3, %v706_v59, -inf }
 0x44e   :  { %708 = vmax.xlane.f32.xlu1 %v707_v60 }
 0x45f   :  { %550 = vrot.lane.b32.xlu1 %v1394_v16, %s1267_s0 }
 0x460   :  { %374 = vrot.lane.b32.xlu0 %v1386_v12, %s1271_s1 }
 0x4d3   :  { %v365_v61 = vpop.xlane.xlu1 %364 }
 0x4d4   :  { %v366_v62 = vsub.f32 %v362_v48, %v365_v61 }
 0x4d6   :  { %v367_v63 = vmul.f32 1.442695, %v366_v62 }
 0x4d7   :  { %v541_v1 = vpop.xlane.xlu0 %540 }
 0x4d8   :  { %1241 = vpow2.f32 %v367_v63  ;;  %v542_v2 = vsub.f32 %v538_v54, %v541_v1  ;;  %v908_v1 = vld [vmem:[%s1566_s8 + $0x8] sm:$0xff] }
 0x4da   :  { %v543_v3 = vmul.f32 1.442695, %v542_v2 }
 0x4db   :  { %v709_v4 = vpop.xlane.xlu1 %708  ;;  %v375_v5 = vpop.permute.xlu0 %374 }
 0x4dc   :  { %1243 = vpow2.f32 %v543_v3  ;;  %v710_v6 = vsub.f32 %v706_v59, %v709_v4  ;;  %1177 = vmatpush3.msra.mxu0 %v375_v5  ;;  %v909_v3 = vld [vmem:[%s1566_s8 + $0x10] sm:$0xff]  ;;  %v910_v4 = vld [vmem:[%s1566_s8 + $0x18] sm:$0xff] }
 0x4dd   :  { %1186 = vmatprep.subr.mxu0 %v1265_v0  ;;  %v912_v5 = vpack.c.bf16 %v910_v4, %v909_v3 }
 0x4de   :  { %v711_v9 = vmul.f32 1.442695, %v710_v6 }
 0x4df   :  { %v551_v17 = vpop.permute.xlu1 %550 }
 0x4e0   :  { %1245 = vpow2.f32 %v711_v9 }
 0x4e2   :  { %v1242_v10 = vpop.eup %1241 }
 0x4e3   :  { %v369_v11 = vsel %vm194_vm3, %v1242_v10, 0.0 }
 0x4e4   :  { %370 = vadd.xlane.f32.xlu1 %v369_v11 }
 0x4e6   :  { %v1244_v12 = vpop.eup %1243 }
 0x4e7   :  { %v545_v13 = vsel %vm194_vm3, %v1244_v12, 0.0 }
 0x4e8   :  { %546 = vadd.xlane.f32.xlu1 %v545_v13 }
 0x4ea   :  { %v1246_v14 = vpop.eup %1245 }
 0x4eb   :  { %v713_v15 = vsel %vm194_vm3, %v1246_v14, 0.0 }
 0x4ec   :  { %714 = vadd.xlane.f32.xlu1 %v713_v15 }
 0x4fd   :  { %718 = vrot.lane.b32.xlu1 %v1394_v16, %s1271_s1 }
 0x571   :  { %v371_v18 = vpop.xlane.xlu1 %370 }
 0x572   :  { %1247 = vrcp.f32 %v371_v18 }
 0x575   :  { %v547_v19 = vpop.xlane.xlu1 %546 }
 0x576   :  { %1249 = vrcp.f32 %v547_v19 }
 0x579   :  { %v715_v20 = vpop.xlane.xlu1 %714 }
 0x57a   :  { %1251 = vrcp.f32 %v715_v20 }
 0x57c   :  { %v1248_v21 = vpop.eup %1247 }
 0x57d   :  { %v373_v22 = vmul.f32 %v1248_v21, %v1242_v10  ;;  %v719_v16 = vpop.permute.xlu1 %718  ;;  %v1116_v21 = vld [vmem:[%s1568_s7] ss:$0 sm:$0xff] }
 0x57f   :  { %1179 = vmatmul.mubr.msk.f32.vlgmr.msra.gmra.mrb[6].mxu0 %vm194_vm3, %v373_v22 }
 0x580   :  { %v1250_v23 = vpop.eup %1249  ;;  %1187 = vmatpush3.msra.mxu0 %v551_v17  ;;  %1188 = vmatprep.mubr.msk.f32.mxu0 %vm1266_vm0, %v1265_v0  ;;  %v1115_v17 = vld [vmem:[%s1567_s6] ss:$0 sm:$0xff] }
 0x581   :  { %v549_v24 = vmul.f32 %v1250_v23, %v1244_v12  ;;  %1196 = vmatprep.subr.mxu0 %v1265_v0 }
 0x583   :  { %1189 = vmatmul.mubr.msk.f32.vlgmr.msra.gmra.mrb[8].mxu0 %vm194_vm3, %v549_v24 }
 0x584   :  { %v1252_v25 = vpop.eup %1251  ;;  %1197 = vmatpush3.msra.mxu0 %v719_v16  ;;  %1198 = vmatprep.mubr.msk.f32.mxu0 %vm1266_vm0, %v1265_v0 }
 0x585   :  { %v717_v26 = vmul.f32 %v1252_v25, %v1246_v14  ;;  %1209 = vmatprep.subr.bf16.mxu0 %v1265_v0  ;;  %v983_v25 = vld [vmem:[%s1569_s10] sm:$0xff] }
 0x587   :  { %1199 = vmatmul.mubr.msk.f32.vlgmr.msra.gmra.mrb[10].mxu0 %vm194_vm3, %v717_v26  ;;  %v984_v26 = vld [vmem:[%s1569_s10 + $0x8] sm:$0xff] }
 0x588   :  { %1213 = vmatprep.mubr.msk.bf16.mxu0 %vm1266_vm0, %v1265_v0  ;;  %v991_v27 = vpack.c.bf16 %v984_v26, %v983_v25 }
 0x652   :  { %v446_v32 = vpop.f32.mrb[6].mxu0 }
 0x653   :  { %451 = vrot.lane.b32.xlu0 %v446_v32, %s1272_s22  ;;  %v1180_v34 = vpop.f32.mrb[7].mxu0  ;;  %v988_v32 = vld [vmem:[%s1569_s10 + $0x28] sm:$0xff] }
 0x654   :  { %v993_v33 = vpack.c.bf16 %v988_v32, %v987_v31  ;;  %v989_v34 = vld [vmem:[%s1569_s10 + $0x30] sm:$0xff] }
 0x656   :  { %v622_v35 = vpop.f32.mrb[8].mxu0 }
 0x657   :  { %626 = vst.msk [vmem:[#allocation2 + $0x8] sm:$0xff] %vm113_vm2, %v622_v35  ;;  %v1190_v36 = vpop.f32.mrb[9].mxu0  ;;  %v990_v35 = vld [vmem:[%s1569_s10 + $0x38] sm:$0xff] }
 0x658   :  { %v994_v36 = vpack.c.bf16 %v990_v35, %v989_v34 }
 0x65a   :  { %v790_v37 = vpop.f32.mrb[10].mxu0 }
 0x65b   :  { %795 = vrot.lane.b32.xlu1 %v790_v37, %s1272_s22  ;;  %v1200_v38 = vpop.f32.mrb[11].mxu0  ;;  %v1117_v37 = vld [vmem:[%s1570_s9] ss:$0 sm:$0xff] }
 0x6c5   :  { %v452_v39 = vpop.permute.xlu0 %451 }
 0x6c6   :  { %455 = vst.msk [vmem:[#allocation2] sm:$0xff] %vm454_vm4, %v452_v39 }
 0x6cd   :  { %v796_v40 = vpop.permute.xlu1 %795  ;;  %v799_v41 = vld [vmem:[#allocation2] sm:$0xff] }
 0x6ce   :  { %798 = vst.msk [vmem:[#allocation2 + $0x8] sm:$0xff] %vm454_vm4, %v796_v40 }
 0x6d5   :  { %v800_v42 = vld [vmem:[#allocation2 + $0x8] sm:$0xff] }
 0x6d6   :  { %v801_v43 = vpack.c.bf16 %v800_v42, %v799_v41 }
 0x6d8   :  { %1206 = vmatmul.mubr.msk.bf16.vlgmr.msra.gmra.mrb[8].mxu1 %vm64_vm1, %v801_v43 }
 0x6d9   :  { %1225 = vmatprep.mubr.msk.bf16.mxu1 %vm1266_vm0, %v1265_v0  ;;  %1218 = vmatpush3.bf16.msra.mxu1 %v991_v27  ;;  %v1121_v27 = vld [vmem:[%s1572_s12] ss:$0 sm:$0xff] }
 0x6da   :  { %1219 = vmatprep.subr.bf16.mxu1 %v1265_v0 }
 0x6dd   :  { %1220 = vmatpush3.bf16.msra.mxu1 %v992_v30  ;;  %v1122_v30 = vld [vmem:[%s1573_s13] ss:$0 sm:$0xff] }
 0x6de   :  { %1221 = vmatprep.subr.bf16.mxu1 %v1265_v0 }
 0x6e1   :  { %1222 = vmatpush3.bf16.msra.mxu1 %v993_v33 }
 0x6e2   :  { %1223 = vmatprep.subr.bf16.mxu1 %v1265_v0 }
 0x6e5   :  { %1224 = vmatpush3.bf16.msra.mxu1 %v994_v36 }
 0x7ab   :  { %v852_v45 = vpop.f32.mrb[8].mxu1 }
 0x7ac   :  { %v853_v46 = vadd.f32 %v1113_v44, %v852_v45  ;;  %v1207_v47 = vpop.f32.mrb[9].mxu1 }
 0x7ad   :  { %v855_v48 = vpop.f32.mrb[10].mxu1 }
 0x7ae   :  { %v856_v49 = vadd.f32 %v1113_v44, %v855_v48  ;;  %v1208_v50 = vpop.f32.mrb[11].mxu1  ;;  %v859_v51 = vadd.f32 %v853_v46, %v1369_v7 }
 0x7b0   :  { %v863_v52 = vsel %vm64_vm1, %v859_v51, 0.0  ;;  %v860_v53 = vadd.f32 %v856_v49, %v1374_v8  ;;  %v907_v8 = vld [vmem:[%s1566_s8] sm:$0xff] }
 0x7b1   :  { %864 = vadd.xlane.f32.xlu0 %v863_v52  ;;  %v911_v2 = vpack.c.bf16 %v908_v1, %v907_v8 }
 0x7b2   :  { %v866_v54 = vsel %vm64_vm1, %v860_v53, 0.0 }
 0x7b3   :  { %867 = vadd.xlane.f32.xlu1 %v866_v54  ;;  %1210 = vmatpush3.bf16.msra.mxu0 %v911_v2 }
 0x7b4   :  { %1211 = vmatprep.subr.bf16.mxu0 %v1265_v0 }
 0x7b7   :  { %1212 = vmatpush3.bf16.msra.mxu0 %v912_v5 }
 0x83e   :  { %v865_v55 = vpop.xlane.xlu0 %864 }
 0x83f   :  { %v870_v56 = vmul.f32 0.03125, %v865_v55 }
 0x840   :  { %v868_v57 = vpop.xlane.xlu1 %867 }
 0x841   :  { %v872_v58 = vsub.f32 %v859_v51, %v870_v56  ;;  %v871_v59 = vmul.f32 0.03125, %v868_v57 }
 0x843   :  { %v873_v60 = vsub.f32 %v860_v53, %v871_v59  ;;  %v874_v61 = vmul.f32 %v872_v58, %v872_v58 }
 0x845   :  { %v876_v62 = vsel %vm64_vm1, %v874_v61, 0.0  ;;  %v875_v63 = vmul.f32 %v873_v60, %v873_v60 }
 0x846   :  { %877 = vadd.xlane.f32.xlu0 %v876_v62  ;;  %v1119_v62 = vld [vmem:[%s1571_s11] ss:$0 sm:$0xff] }
 0x847   :  { %v879_v7 = vsel %vm64_vm1, %v875_v63, 0.0 }
 0x84a   :  { %880 = vadd.xlane.f32.xlu0 %v879_v7 }
 0x8d3   :  { %v878_v6 = vpop.xlane.xlu0 %877 }
 0x8d4   :  { %v882_v9 = vmul.f32 0.03125, %v878_v6 }
 0x8d6   :  { %v884_v10 = vadd.f32 1e-05, %v882_v9 }
 0x8d7   :  { %v881_v11 = vpop.xlane.xlu0 %880 }
 0x8d8   :  { %1253 = vrsqrt.f32 %v884_v10  ;;  %v883_v12 = vmul.f32 0.03125, %v881_v11 }
 0x8da   :  { %v885_v13 = vadd.f32 1e-05, %v883_v12 }
 0x8dc   :  { %1255 = vrsqrt.f32 %v885_v13 }
 0x8e2   :  { %v1254_v14 = vpop.eup %1253 }
 0x8e3   :  { %v888_v15 = vmul.f32 %v1254_v14, %v872_v58 }
 0x8e5   :  { %v896_v19 = vmul.f32 %v1115_v17, %v888_v15 }
 0x8e6   :  { %v1256_v18 = vpop.eup %1255 }
 0x8e7   :  { %v889_v20 = vmul.f32 %v1256_v18, %v873_v60  ;;  %v1500_v23 = vadd.f32 %v1116_v21, %v896_v19 }
 0x8e9   :  { %v897_v22 = vmul.f32 %v1115_v17, %v889_v20 }
 0x8eb   :  { %v1502_v24 = vadd.f32 %v1116_v21, %v897_v22 }
 0x8ed   :  { %v906_v16 = vpack.c.bf16 %v1502_v24, %v1500_v23 }
 0x8ef   :  { %1214 = vmatmul.mubr.msk.bf16.vlgmr.msra.gmra.mrb[12].mxu0 %vm64_vm1, %v906_v16 }
 0x9c2   :  { %v957_v38 = vpop.f32.mrb[12].mxu0 }
 0x9c3   :  { %v958_v39 = vadd.f32 %v1117_v37, %v957_v38  ;;  %v1215_v40 = vpop.f32.mrb[13].mxu0 }
 0x9c4   :  { %v960_v41 = vpop.f32.mrb[14].mxu0 }
 0x9c5   :  { %v964_v42 = vmul.f32 %v958_v39, %v958_v39  ;;  %v961_v0 = vadd.f32 %v1117_v37, %v960_v41  ;;  %v1216_v43 = vpop.f32.mrb[15].mxu0 }
 0x9c7   :  { %v966_v44 = vmul.f32 %v964_v42, %v958_v39  ;;  %v965_v45 = vmul.f32 %v961_v0, %v961_v0 }
 0x9c9   :  { %v968_v46 = vmul.f32 0.044715, %v966_v44  ;;  %v967_v47 = vmul.f32 %v965_v45, %v961_v0 }
 0x9cb   :  { %v970_v48 = vadd.f32 %v968_v46, %v958_v39  ;;  %v969_v49 = vmul.f32 0.044715, %v967_v47 }
 0x9cd   :  { %v972_v50 = vmul.f32 0.7978846, %v970_v48  ;;  %v971_v51 = vadd.f32 %v969_v49, %v961_v0 }
 0x9cf   :  { %1257 = vtanh.f32 %v972_v50  ;;  %v973_v52 = vmul.f32 0.7978846, %v971_v51 }
 0x9d1   :  { %1259 = vtanh.f32 %v973_v52 }
 0x9d9   :  { %v1258_v53 = vpop.eup %1257 }
 0x9da   :  { %v976_v54 = vadd.f32 1.0, %v1258_v53 }
 0x9db   :  { %v1260_v55 = vpop.eup %1259 }
 0x9dc   :  { %v978_v56 = vmul.f32 0.5, %v976_v54  ;;  %v977_v57 = vadd.f32 1.0, %v1260_v55 }
 0x9de   :  { %v979_v58 = vmul.f32 0.5, %v977_v57  ;;  %v980_v59 = vmul.f32 %v978_v56, %v958_v39 }
 0x9e0   :  { %v981_v60 = vmul.f32 %v979_v58, %v961_v0 }
 0x9e2   :  { %v982_v61 = vpack.c.bf16 %v981_v60, %v980_v59 }
 0x9e4   :  { %1226 = vmatmul.mubr.msk.bf16.vlgmr.msra.gmra.mrb[12].mxu1 %vm1002_vm5, %v982_v61 }
 0xab7   :  { %v1040_v63 = vpop.f32.mrb[12].mxu1 }
 0xab8   :  { %v1041_v7 = vadd.f32 %v1119_v62, %v1040_v63  ;;  %v1227_v8 = vpop.f32.mrb[13].mxu1 }
 0xab9   :  { %v1043_v1 = vpop.f32.mrb[14].mxu1 }
 0xaba   :  { %v1044_v2 = vadd.f32 %v1119_v62, %v1043_v1  ;;  %v1228_v3 = vpop.f32.mrb[15].mxu1  ;;  %v1047_v4 = vadd.f32 %v1041_v7, %v1500_v23 }
 0xabc   :  { %v1051_v5 = vsel %vm64_vm1, %v1047_v4, 0.0  ;;  %v1048_v6 = vadd.f32 %v1044_v2, %v1502_v24 }
 0xabd   :  { %1052 = vadd.xlane.f32.xlu1 %v1051_v5 }
 0xabe   :  { %v1054_v9 = vsel %vm64_vm1, %v1048_v6, 0.0 }
 0xabf   :  { %1055 = vadd.xlane.f32.xlu0 %v1054_v9 }
 0xb4a   :  { %v1053_v10 = vpop.xlane.xlu1 %1052 }
 0xb4b   :  { %v1057_v11 = vmul.f32 0.03125, %v1053_v10 }
 0xb4c   :  { %v1056_v12 = vpop.xlane.xlu0 %1055 }
 0xb4d   :  { %v1059_v13 = vsub.f32 %v1047_v4, %v1057_v11  ;;  %v1058_v14 = vmul.f32 0.03125, %v1056_v12 }
 0xb4f   :  { %v1060_v15 = vsub.f32 %v1048_v6, %v1058_v14  ;;  %v1061_v17 = vmul.f32 %v1059_v13, %v1059_v13 }
 0xb51   :  { %v1063_v18 = vsel %vm64_vm1, %v1061_v17, 0.0  ;;  %v1062_v19 = vmul.f32 %v1060_v15, %v1060_v15 }
 0xb52   :  { %1064 = vadd.xlane.f32.xlu1 %v1063_v18 }
 0xb53   :  { %v1066_v20 = vsel %vm64_vm1, %v1062_v19, 0.0 }
 0xb54   :  { %1067 = vadd.xlane.f32.xlu0 %v1066_v20 }
 0xbdf   :  { %v1065_v21 = vpop.xlane.xlu1 %1064 }
 0xbe0   :  { %v1069_v22 = vmul.f32 0.03125, %v1065_v21 }
 0xbe1   :  { %v1068_v23 = vpop.xlane.xlu0 %1067 }
 0xbe2   :  { %v1071_v24 = vadd.f32 1e-05, %v1069_v22  ;;  %v1070_v16 = vmul.f32 0.03125, %v1068_v23 }
 0xbe4   :  { %1261 = vrsqrt.f32 %v1071_v24  ;;  %v1072_v25 = vadd.f32 1e-05, %v1070_v16 }
 0xbe6   :  { %1263 = vrsqrt.f32 %v1072_v25 }
 0xbee   :  { %v1262_v26 = vpop.eup %1261 }
 0xbef   :  { %v1075_v28 = vmul.f32 %v1262_v26, %v1059_v13 }
 0xbf0   :  { %v1264_v29 = vpop.eup %1263 }
 0xbf1   :  { %v1083_v31 = vmul.f32 %v1121_v27, %v1075_v28  ;;  %v1076_v32 = vmul.f32 %v1264_v29, %v1060_v15 }
 0xbf3   :  { %v1091_v33 = vadd.f32 %v1122_v30, %v1083_v31  ;;  %v1084_v34 = vmul.f32 %v1121_v27, %v1076_v32 }
 0xbf5   :  { %1093 = vst.msk [vmem:[%s1574_s14] sm:$0xff] %vm64_vm1, %v1091_v33  ;;  %v1092_v35 = vadd.f32 %v1122_v30, %v1084_v34 }
 0xbf7   :  { %1094 = vst.msk [vmem:[%s1574_s14 + $0x8] sm:$0xff] %vm64_vm1, %v1092_v35 }

</bundles_post_ra>
